<compile_context>
chip_gen: v5e
topology: v5e:2x2
jax: 0.10.0
libtpu: 0.0.40
codegen_flags: <defaults>
</compile_context>

<pallas_src>
import functools

import jax
import jax.numpy as jnp
from jax.experimental import pallas as pl
from jax.experimental.pallas import tpu as pltpu

BN_EPS = 1e-5


def _round_up(x, m):
    return -(-x // m) * m


def _pick_tile(npos, halo, cin, cout, itemsize, budget=12 * 1024 * 1024):
    """Largest lane-dense (multiple of 128) tile whose per-step VMEM estimate fits."""
    npos128 = _round_up(npos, 128)
    cands = sorted({min(npos128, 8192), 4096, 2048, 1024, 512, 256, 128}, reverse=True)
    for t in cands:
        if t > npos128:
            continue
        ntiles = -(-npos // t)
        lenp = (ntiles - 1) * t + t + _round_up(halo, 128)
        est = (2 * cin * lenp * itemsize            # resident flat input (pipeline bufs)
               + 2 * 4 * cout * t * itemsize        # y output block (double buffered)
               + 2 * t * 4                          # validity mask
               + (4 * cout + 3 * cin) * t * 4       # f32 accumulator + live tap slices
               + 2 * 16 * 4 * cout * cin * itemsize)  # tap weights
        if est <= budget:
            return t
    return 128


def _combined_phase_weights(wt3, wt5, wt7, alphas, cin, cout):
    """Alpha-fold the 3 branches into one 7x7 kernel, split into 4 sub-pixel phases.

    Returns (4*Cout, 16*Cin): row m = (2a+b)*Cout + co, col k = (4dh+dw)*Cin + ci.
    """
    def flip_t(wt):  # torch (Cin,Cout,k,k) -> (k,k,Cin,Cout), spatially flipped
        return jnp.transpose(wt[:, :, ::-1, ::-1], (2, 3, 0, 1)).astype(jnp.float32)

    # All branches are centered on the same 7x7 tap grid -> sum them (alpha-folded).
    wc = jnp.zeros((7, 7, cin, cout), jnp.float32)
    wc = wc.at[2:5, 2:5].add(alphas[0] * flip_t(wt3))
    wc = wc.at[1:6, 1:6].add(alphas[1] * flip_t(wt5))
    wc = wc.at[0:7, 0:7].add(alphas[2] * flip_t(wt7))

    # Phase (a,b): output pixel (2r+a, 2c+b) uses taps kh = 2*dh + 1 - a,
    # kw = 2*dw + 1 - b applied to padded input xp[r+dh, c+dw]  (dh,dw in [0,4)).
    wk = jnp.zeros((2, 2, cout, 4, 4, cin), jnp.float32)
    for a in (0, 1):
        for b in (0, 1):
            sub = wc[(1 - a)::2, (1 - b)::2]              # (nh, nw, Cin, Cout)
            nh, nw = sub.shape[0], sub.shape[1]
            wk = wk.at[a, b, :, :nh, :nw, :].set(jnp.transpose(sub, (3, 0, 1, 2)))
    return wk.reshape(4 * cout, 16 * cin)


# ---------------------------------------------------------------------------
# Kernel: fused mixed transposed conv (polyphase, alpha-folded, in-VMEM im2col)
#         + ReLU + per-n BatchNorm partial statistics.
# ---------------------------------------------------------------------------
def _conv_relu_stats_kernel(w_ref, x_ref, m_ref, y_ref, stat_ref, *,
                            tile, win, wp, n_taps=16):
    # w_ref   : (16, 4*Cout, Cin)   alpha-folded polyphase tap weights (grid resident)
    # x_ref   : (1, Cin, LENP)      flat padded image for batch item n (resident over t)
    # m_ref   : (1, TILE)           1.0 at valid output positions of this tile (f32)
    # y_ref   : (1, 4*Cout, TILE)   ReLU'd phase-separated output (lane dense)
    # stat_ref: (1, 4*Cout, 2)      per-n [sum, sum_sq] BN partials, accumulated over t
    t = pl.program_id(1)

    @pl.when(t == 0)
    def _():
        stat_ref[...] = jnp.zeros_like(stat_ref)

    # In-VMEM im2col: one 128-aligned window of the resident input covers all 16 taps
    # (tap (dh,dw) is a static lane-offset slice at dh*Wp + dw).  No HBM expansion.
    start = pl.multiple_of(t * tile, 128)
    window = x_ref[0, :, pl.ds(start, win)]              # (Cin, WIN)

    acc = None                                           # f32 accumulator (4*Cout, TILE)
    for i in range(n_taps):
        dh, dw = i // 4, i % 4
        off = dh * wp + dw
        part = jnp.dot(w_ref[i], window[:, off:off + tile],
                       preferred_element_type=jnp.float32)
        acc = part if acc is None else acc + part

    y = jnp.maximum(acc, 0.0)
    y_ref[0] = y.astype(y_ref.dtype)                     # bf16 intermediate on perf path

    # Masked BN partials from the f32 accumulator; resident accumulate, 1 store per n.
    m = m_ref[...]                                       # (1, TILE) -> broadcasts
    ym = y * m
    s = jnp.sum(ym, axis=-1, keepdims=True)              # (4*Cout, 1)
    q = jnp.sum(ym * y, axis=-1, keepdims=True)          # (4*Cout, 1)
    stat_ref[0] += jnp.concatenate([s, q], axis=-1)      # (4*Cout, 2)


@functools.partial(jax.jit, static_argnames=("precision",))
def mixed_op_forward(x_nchw, wt3, wt5, wt7, alphas, gamma, beta, precision="bf16"):
    N, Cin, H, W = x_nchw.shape
    Cout = wt3.shape[1]
    op_dtype = jnp.bfloat16 if precision == "bf16" else jnp.float32
    itemsize = 2 if precision == "bf16" else 4

    # Flattened padded-image geometry: pad 1 top/left, 2 bottom/right; row stride Wp.
    # Output positions p = r*Wp + c are computed for all c in [0, Wp) (the 3 columns
    # c >= W per row are garbage, masked out of the stats and sliced away in glue).
    Hp, Wp = H + 3, W + 3
    npos = H * Wp                       # positions computed per image
    halo = 3 * Wp + 3                   # largest tap offset in the flat padded image
    tile = _pick_tile(npos, halo, Cin, Cout, itemsize)
    T = -(-npos // tile)
    win = tile + _round_up(halo, 128)
    lenp = (T - 1) * tile + win         # >= Hp*Wp always

    # Alpha-folded, branch-fused polyphase tap weights: (16, 4*Cout, Cin).
    wmat = _combined_phase_weights(wt3, wt5, wt7, alphas.astype(jnp.float32), Cin, Cout)
    w_taps = wmat.reshape(4 * Cout, 16, Cin).transpose(1, 0, 2).astype(op_dtype)

    # Flat padded input, cast to the MXU operand dtype BEFORE padding: the only
    # pre-kernel materialization is one (N, Cin, lenp) copy (no 16x im2col in HBM).
    xb = x_nchw.astype(op_dtype)
    xp = jnp.pad(xb, ((0, 0), (0, 0), (1, 2), (1, 2)))
    xflat = xp.reshape(N, Cin, Hp * Wp)
    xflat = jnp.pad(xflat, ((0, 0), (0, 0), (0, lenp - Hp * Wp)))

    # Valid-position mask (drops the 3 garbage columns per row and the tail padding).
    pos = jnp.arange(T * tile, dtype=jnp.int32)
    mask = ((pos < npos) & ((pos % Wp) < W)).astype(jnp.float32).reshape(1, T * tile)

    kernel = functools.partial(_conv_relu_stats_kernel, tile=tile, win=win, wp=Wp)

    y_phase, stats = pl.pallas_call(
        kernel,
        grid=(N, T),
        in_specs=[
            pl.BlockSpec((16, 4 * Cout, Cin), lambda n, t: (0, 0, 0)),   # resident
            pl.BlockSpec((1, Cin, lenp), lambda n, t: (n, 0, 0)),        # fetched once/n
            pl.BlockSpec((1, tile), lambda n, t: (0, t)),
        ],
        out_specs=[
            pl.BlockSpec((1, 4 * Cout, tile), lambda n, t: (n, 0, t)),
            pl.BlockSpec((1, 4 * Cout, 2), lambda n, t: (n, 0, 0)),      # accumulator
        ],
        out_shape=[
            jax.ShapeDtypeStruct((N, 4 * Cout, T * tile), op_dtype),     # bf16 interm.
            jax.ShapeDtypeStruct((N, 4 * Cout, 2), jnp.float32),
        ],
        compiler_params=pltpu.CompilerParams(
            dimension_semantics=("parallel", "arbitrary"),
            vmem_limit_bytes=32 * 1024 * 1024),
    )(w_taps, xflat, mask)

    # BN statistics: per-(n, phase) group mean/M2 combined with Chan's formula to
    # avoid the global E[y^2] - E[y]^2 cancellation (correctness-review item).
    cnt_g = jnp.float32(H * W)                               # elements per group
    s = stats[:, :, 0].reshape(N, 4, Cout)
    q = stats[:, :, 1].reshape(N, 4, Cout)
    mean_g = s / cnt_g
    m2_g = q - s * mean_g
    mean = jnp.mean(mean_g, axis=(0, 1))                     # equal-sized groups
    m2 = jnp.sum(m2_g, axis=(0, 1)) + cnt_g * jnp.sum((mean_g - mean) ** 2, axis=(0, 1))
    var = jnp.maximum(m2 / (jnp.float32(N * 4) * cnt_g), 0.0)    # biased (training) var
    scale = gamma.astype(jnp.float32) * jax.lax.rsqrt(var + BN_EPS)
    shift = beta.astype(jnp.float32) - mean * scale

    # BN affine fused (by XLA) with the depth-to-space layout pass: one read of the
    # bf16 intermediate, one write of the final NCHW tensor (kernel 2 removed).
    y = y_phase[:, :, :npos].reshape(N, 4, Cout, H, Wp)[..., :W].astype(jnp.float32)
    y = y * scale.reshape(1, 1, Cout, 1, 1) + shift.reshape(1, 1, Cout, 1, 1)
    y = y.reshape(N, 2, 2, Cout, H, W)
    out = jnp.transpose(y, (0, 3, 4, 1, 5, 2)).reshape(N, Cout, 2 * H, 2 * W)
    return out


# ---------------------------------------------------------------------------
# Pure-JAX reference (ConvTranspose2d = lhs-dilated conv), training-mode BN.
# ---------------------------------------------------------------------------
def reference_forward(x, wts, alphas, gamma, beta):
    outs = []
    for wt in wts:
        k = wt.shape[-1]
        p = (k - 1) // 2
        w = jnp.transpose(wt[:, :, ::-1, ::-1], (1, 0, 2, 3))     # OIHW, flipped
        outs.append(jax.lax.conv_general_dilated(
            x, w, window_strides=(1, 1),
            padding=((p, p + 1), (p, p + 1)),
            lhs_dilation=(2, 2),
            dimension_numbers=("NCHW", "OIHW", "NCHW")))
    y = sum(a * o for a, o in zip(alphas, outs))
    y = jnp.maximum(y, 0.0)
    mean = jnp.mean(y, axis=(0, 2, 3), keepdims=True)
    var = jnp.mean((y - mean) ** 2, axis=(0, 2, 3), keepdims=True)
    return ((y - mean) * jax.lax.rsqrt(var + BN_EPS)
            * gamma.reshape(1, -1, 1, 1) + beta.reshape(1, -1, 1, 1))


if __name__ == "__main__":
    N, Cin, Cout, H, W = 2, 4, 8, 16, 16

    key = jax.random.PRNGKey(0)
    kx, k3, k5, k7 = jax.random.split(key, 4)
    x = jax.random.normal(kx, (N, Cin, H, W), jnp.float32)
    # synthetic parameters (torch ConvTranspose2d layout: Cin, Cout, k, k)
    wt3 = 0.1 * jax.random.normal(k3, (Cin, Cout, 3, 3), jnp.float32)
    wt5 = 0.1 * jax.random.normal(k5, (Cin, Cout, 5, 5), jnp.float32)
    wt7 = 0.1 * jax.random.normal(k7, (Cin, Cout, 7, 7), jnp.float32)
    alphas = jnp.full((3,), 1.0 / 3.0, jnp.float32)               # nn.Parameter init
    gamma = jnp.ones((Cout,), jnp.float32)                        # BN weight init
    beta = jnp.zeros((Cout,), jnp.float32)                        # BN bias init

    ref = reference_forward(x, (wt3, wt5, wt7), alphas, gamma, beta)

    # f32 MXU operands + f32 intermediate: tight check of the fused polyphase math.
    out_f32 = jax.block_until_ready(
        mixed_op_forward(x, wt3, wt5, wt7, alphas, gamma, beta, precision="f32"))
    assert out_f32.shape == (N, Cout, 2 * H, 2 * W), out_f32.shape
    err_f32 = float(jnp.max(jnp.abs(out_f32 - ref)))
    assert err_f32 < 2e-3, f"f32 path mismatch vs reference, max abs err = {err_f32}"

    # bf16 perf path: bf16 MXU operands AND bf16 intermediate storage (f32 accum/stats);
    # tolerance covers bf16 operand quantization + bf16 rounding of the stored activations.
    out_bf16 = jax.block_until_ready(
        mixed_op_forward(x, wt3, wt5, wt7, alphas, gamma, beta, precision="bf16"))
    err_bf16 = float(jnp.max(jnp.abs(out_bf16 - ref)))
    assert err_bf16 < 8e-2, f"bf16 path mismatch vs reference, max abs err = {err_bf16}"

    print("KERNEL_OK")
</pallas_src>

<mosaic_0001>
module attributes {stable_mosaic.version = 11 : i64} {
  func.func @_conv_relu_stats_kernel(%arg0: i32, %arg1: i32, %arg2: memref<16x32x4xf32, #tpu.memory_space<vmem>>, %arg3: memref<1x4x512xf32, #tpu.memory_space<vmem>>, %arg4: memref<1x384xf32, #tpu.memory_space<vmem>>, %arg5: memref<1x32x384xf32, #tpu.memory_space<vmem>>, %arg6: memref<1x32x2xf32, #tpu.memory_space<vmem>>) attributes {dimension_semantics = [#tpu.dimension_semantics<parallel>, #tpu.dimension_semantics<arbitrary>], iteration_bounds = array<i64: 2, 1>, scalar_prefetch = 0 : i64, scratch_operands = 0 : i64, tpu.core_type = #tpu.core_type<tc>, window_params = [{pipeline_mode = #tpu.pipeline_mode<synchronous>, transform_indices = @transform_0, window_bounds = array<i64: 16, 32, 4>}, {transform_indices = @transform_1, window_bounds = array<i64: 1, 4, 512>}, {transform_indices = @transform_2, window_bounds = array<i64: 1, 384>}, {transform_indices = @transform_3, window_bounds = array<i64: 1, 32, 384>}, {transform_indices = @transform_4, window_bounds = array<i64: 1, 32, 2>}]} {
    %c0_i32 = arith.constant 0 : i32
    %0 = arith.cmpi eq, %arg1, %c0_i32 : i32
    %1 = arith.extui %0 : i1 to i32
    %c0_i32_0 = arith.constant 0 : i32
    %2 = arith.cmpi ne, %1, %c0_i32_0 : i32
    scf.if %2 {
      %cst_64 = arith.constant 0.000000e+00 : f32
      %107 = vector.broadcast %cst_64 : f32 to vector<1x32x2xf32>
      %c0_65 = arith.constant 0 : index
      %c0_66 = arith.constant 0 : index
      %c0_67 = arith.constant 0 : index
      %108 = vector.load %arg6[%c0_65, %c0_66, %c0_67] : memref<1x32x2xf32, #tpu.memory_space<vmem>>, vector<1x32x2xf32>
      tpu.vector_store %arg6[%c0_65, %c0_66, %c0_67], %107 {strides = array<i32>} : memref<1x32x2xf32, #tpu.memory_space<vmem>>, vector<1x32x2xf32>,
    } else {
    }
    %c384_i32 = arith.constant 384 : i32
    %3 = arith.muli %arg1, %c384_i32 : i32
    %4 = tpu.assume_multiple %3, 128 : i32
    %c0 = arith.constant 0 : index
    %c0_1 = arith.constant 0 : index
    %5 = arith.index_cast %4 : i32 to index
    %6 = vector.load %arg3[%c0, %c0_1, %5] : memref<1x4x512xf32, #tpu.memory_space<vmem>>, vector<1x4x512xf32>
    %7 = vector.shape_cast %6 : vector<1x4x512xf32> to vector<4x512xf32>
    %c0_2 = arith.constant 0 : index
    %c0_3 = arith.constant 0 : index
    %c0_4 = arith.constant 0 : index
    %8 = vector.load %arg2[%c0_2, %c0_3, %c0_4] : memref<16x32x4xf32, #tpu.memory_space<vmem>>, vector<1x32x4xf32>
    %9 = vector.shape_cast %8 : vector<1x32x4xf32> to vector<32x4xf32>
    %10 = vector.extract_strided_slice %7 {offsets = [0, 0], sizes = [4, 384], strides = [1, 1]} : vector<4x512xf32> to vector<4x384xf32>
    %cst = arith.constant dense<0.000000e+00> : vector<32x384xf32>
    %11 = tpu.matmul %9, %10, %cst {dimension_numbers = #tpu.dot_dimension_numbers<[1], [0], [0], [1], [0, 0, 1, 1], [], []>} : vector<32x4xf32>, vector<4x384xf32>, vector<32x384xf32> -> vector<32x384xf32>
    %c1 = arith.constant 1 : index
    %c0_5 = arith.constant 0 : index
    %c0_6 = arith.constant 0 : index
    %12 = vector.load %arg2[%c1, %c0_5, %c0_6] : memref<16x32x4xf32, #tpu.memory_space<vmem>>, vector<1x32x4xf32>
    %13 = vector.shape_cast %12 : vector<1x32x4xf32> to vector<32x4xf32>
    %14 = vector.extract_strided_slice %7 {offsets = [0, 1], sizes = [4, 384], strides = [1, 1]} : vector<4x512xf32> to vector<4x384xf32>
    %cst_7 = arith.constant dense<0.000000e+00> : vector<32x384xf32>
    %15 = tpu.matmul %13, %14, %cst_7 {dimension_numbers = #tpu.dot_dimension_numbers<[1], [0], [0], [1], [0, 0, 1, 1], [], []>} : vector<32x4xf32>, vector<4x384xf32>, vector<32x384xf32> -> vector<32x384xf32>
    %16 = arith.addf %11, %15 : vector<32x384xf32>
    %c2 = arith.constant 2 : index
    %c0_8 = arith.constant 0 : index
    %c0_9 = arith.constant 0 : index
    %17 = vector.load %arg2[%c2, %c0_8, %c0_9] : memref<16x32x4xf32, #tpu.memory_space<vmem>>, vector<1x32x4xf32>
    %18 = vector.shape_cast %17 : vector<1x32x4xf32> to vector<32x4xf32>
    %19 = vector.extract_strided_slice %7 {offsets = [0, 2], sizes = [4, 384], strides = [1, 1]} : vector<4x512xf32> to vector<4x384xf32>
    %cst_10 = arith.constant dense<0.000000e+00> : vector<32x384xf32>
    %20 = tpu.matmul %18, %19, %cst_10 {dimension_numbers = #tpu.dot_dimension_numbers<[1], [0], [0], [1], [0, 0, 1, 1], [], []>} : vector<32x4xf32>, vector<4x384xf32>, vector<32x384xf32> -> vector<32x384xf32>
    %21 = arith.addf %16, %20 : vector<32x384xf32>
    %c3 = arith.constant 3 : index
    %c0_11 = arith.constant 0 : index
    %c0_12 = arith.constant 0 : index
    %22 = vector.load %arg2[%c3, %c0_11, %c0_12] : memref<16x32x4xf32, #tpu.memory_space<vmem>>, vector<1x32x4xf32>
    %23 = vector.shape_cast %22 : vector<1x32x4xf32> to vector<32x4xf32>
    %24 = vector.extract_strided_slice %7 {offsets = [0, 3], sizes = [4, 384], strides = [1, 1]} : vector<4x512xf32> to vector<4x384xf32>
    %cst_13 = arith.constant dense<0.000000e+00> : vector<32x384xf32>
    %25 = tpu.matmul %23, %24, %cst_13 {dimension_numbers = #tpu.dot_dimension_numbers<[1], [0], [0], [1], [0, 0, 1, 1], [], []>} : vector<32x4xf32>, vector<4x384xf32>, vector<32x384xf32> -> vector<32x384xf32>
    %26 = arith.addf %21, %25 : vector<32x384xf32>
    %c4 = arith.constant 4 : index
    %c0_14 = arith.constant 0 : index
    %c0_15 = arith.constant 0 : index
    %27 = vector.load %arg2[%c4, %c0_14, %c0_15] : memref<16x32x4xf32, #tpu.memory_space<vmem>>, vector<1x32x4xf32>
    %28 = vector.shape_cast %27 : vector<1x32x4xf32> to vector<32x4xf32>
    %29 = vector.extract_strided_slice %7 {offsets = [0, 19], sizes = [4, 384], strides = [1, 1]} : vector<4x512xf32> to vector<4x384xf32>
    %cst_16 = arith.constant dense<0.000000e+00> : vector<32x384xf32>
    %30 = tpu.matmul %28, %29, %cst_16 {dimension_numbers = #tpu.dot_dimension_numbers<[1], [0], [0], [1], [0, 0, 1, 1], [], []>} : vector<32x4xf32>, vector<4x384xf32>, vector<32x384xf32> -> vector<32x384xf32>
    %31 = arith.addf %26, %30 : vector<32x384xf32>
    %c5 = arith.constant 5 : index
    %c0_17 = arith.constant 0 : index
    %c0_18 = arith.constant 0 : index
    %32 = vector.load %arg2[%c5, %c0_17, %c0_18] : memref<16x32x4xf32, #tpu.memory_space<vmem>>, vector<1x32x4xf32>
    %33 = vector.shape_cast %32 : vector<1x32x4xf32> to vector<32x4xf32>
    %34 = vector.extract_strided_slice %7 {offsets = [0, 20], sizes = [4, 384], strides = [1, 1]} : vector<4x512xf32> to vector<4x384xf32>
    %cst_19 = arith.constant dense<0.000000e+00> : vector<32x384xf32>
    %35 = tpu.matmul %33, %34, %cst_19 {dimension_numbers = #tpu.dot_dimension_numbers<[1], [0], [0], [1], [0, 0, 1, 1], [], []>} : vector<32x4xf32>, vector<4x384xf32>, vector<32x384xf32> -> vector<32x384xf32>
    %36 = arith.addf %31, %35 : vector<32x384xf32>
    %c6 = arith.constant 6 : index
    %c0_20 = arith.constant 0 : index
    %c0_21 = arith.constant 0 : index
    %37 = vector.load %arg2[%c6, %c0_20, %c0_21] : memref<16x32x4xf32, #tpu.memory_space<vmem>>, vector<1x32x4xf32>
    %38 = vector.shape_cast %37 : vector<1x32x4xf32> to vector<32x4xf32>
    %39 = vector.extract_strided_slice %7 {offsets = [0, 21], sizes = [4, 384], strides = [1, 1]} : vector<4x512xf32> to vector<4x384xf32>
    %cst_22 = arith.constant dense<0.000000e+00> : vector<32x384xf32>
    %40 = tpu.matmul %38, %39, %cst_22 {dimension_numbers = #tpu.dot_dimension_numbers<[1], [0], [0], [1], [0, 0, 1, 1], [], []>} : vector<32x4xf32>, vector<4x384xf32>, vector<32x384xf32> -> vector<32x384xf32>
    %41 = arith.addf %36, %40 : vector<32x384xf32>
    %c7 = arith.constant 7 : index
    %c0_23 = arith.constant 0 : index
    %c0_24 = arith.constant 0 : index
    %42 = vector.load %arg2[%c7, %c0_23, %c0_24] : memref<16x32x4xf32, #tpu.memory_space<vmem>>, vector<1x32x4xf32>
    %43 = vector.shape_cast %42 : vector<1x32x4xf32> to vector<32x4xf32>
    %44 = vector.extract_strided_slice %7 {offsets = [0, 22], sizes = [4, 384], strides = [1, 1]} : vector<4x512xf32> to vector<4x384xf32>
    %cst_25 = arith.constant dense<0.000000e+00> : vector<32x384xf32>
    %45 = tpu.matmul %43, %44, %cst_25 {dimension_numbers = #tpu.dot_dimension_numbers<[1], [0], [0], [1], [0, 0, 1, 1], [], []>} : vector<32x4xf32>, vector<4x384xf32>, vector<32x384xf32> -> vector<32x384xf32>
    %46 = arith.addf %41, %45 : vector<32x384xf32>
    %c8 = arith.constant 8 : index
    %c0_26 = arith.constant 0 : index
    %c0_27 = arith.constant 0 : index
    %47 = vector.load %arg2[%c8, %c0_26, %c0_27] : memref<16x32x4xf32, #tpu.memory_space<vmem>>, vector<1x32x4xf32>
    %48 = vector.shape_cast %47 : vector<1x32x4xf32> to vector<32x4xf32>
    %49 = vector.extract_strided_slice %7 {offsets = [0, 38], sizes = [4, 384], strides = [1, 1]} : vector<4x512xf32> to vector<4x384xf32>
    %cst_28 = arith.constant dense<0.000000e+00> : vector<32x384xf32>
    %50 = tpu.matmul %48, %49, %cst_28 {dimension_numbers = #tpu.dot_dimension_numbers<[1], [0], [0], [1], [0, 0, 1, 1], [], []>} : vector<32x4xf32>, vector<4x384xf32>, vector<32x384xf32> -> vector<32x384xf32>
    %51 = arith.addf %46, %50 : vector<32x384xf32>
    %c9 = arith.constant 9 : index
    %c0_29 = arith.constant 0 : index
    %c0_30 = arith.constant 0 : index
    %52 = vector.load %arg2[%c9, %c0_29, %c0_30] : memref<16x32x4xf32, #tpu.memory_space<vmem>>, vector<1x32x4xf32>
    %53 = vector.shape_cast %52 : vector<1x32x4xf32> to vector<32x4xf32>
    %54 = vector.extract_strided_slice %7 {offsets = [0, 39], sizes = [4, 384], strides = [1, 1]} : vector<4x512xf32> to vector<4x384xf32>
    %cst_31 = arith.constant dense<0.000000e+00> : vector<32x384xf32>
    %55 = tpu.matmul %53, %54, %cst_31 {dimension_numbers = #tpu.dot_dimension_numbers<[1], [0], [0], [1], [0, 0, 1, 1], [], []>} : vector<32x4xf32>, vector<4x384xf32>, vector<32x384xf32> -> vector<32x384xf32>
    %56 = arith.addf %51, %55 : vector<32x384xf32>
    %c10 = arith.constant 10 : index
    %c0_32 = arith.constant 0 : index
    %c0_33 = arith.constant 0 : index
    %57 = vector.load %arg2[%c10, %c0_32, %c0_33] : memref<16x32x4xf32, #tpu.memory_space<vmem>>, vector<1x32x4xf32>
    %58 = vector.shape_cast %57 : vector<1x32x4xf32> to vector<32x4xf32>
    %59 = vector.extract_strided_slice %7 {offsets = [0, 40], sizes = [4, 384], strides = [1, 1]} : vector<4x512xf32> to vector<4x384xf32>
    %cst_34 = arith.constant dense<0.000000e+00> : vector<32x384xf32>
    %60 = tpu.matmul %58, %59, %cst_34 {dimension_numbers = #tpu.dot_dimension_numbers<[1], [0], [0], [1], [0, 0, 1, 1], [], []>} : vector<32x4xf32>, vector<4x384xf32>, vector<32x384xf32> -> vector<32x384xf32>
    %61 = arith.addf %56, %60 : vector<32x384xf32>
    %c11 = arith.constant 11 : index
    %c0_35 = arith.constant 0 : index
    %c0_36 = arith.constant 0 : index
    %62 = vector.load %arg2[%c11, %c0_35, %c0_36] : memref<16x32x4xf32, #tpu.memory_space<vmem>>, vector<1x32x4xf32>
    %63 = vector.shape_cast %62 : vector<1x32x4xf32> to vector<32x4xf32>
    %64 = vector.extract_strided_slice %7 {offsets = [0, 41], sizes = [4, 384], strides = [1, 1]} : vector<4x512xf32> to vector<4x384xf32>
    %cst_37 = arith.constant dense<0.000000e+00> : vector<32x384xf32>
    %65 = tpu.matmul %63, %64, %cst_37 {dimension_numbers = #tpu.dot_dimension_numbers<[1], [0], [0], [1], [0, 0, 1, 1], [], []>} : vector<32x4xf32>, vector<4x384xf32>, vector<32x384xf32> -> vector<32x384xf32>
    %66 = arith.addf %61, %65 : vector<32x384xf32>
    %c12 = arith.constant 12 : index
    %c0_38 = arith.constant 0 : index
    %c0_39 = arith.constant 0 : index
    %67 = vector.load %arg2[%c12, %c0_38, %c0_39] : memref<16x32x4xf32, #tpu.memory_space<vmem>>, vector<1x32x4xf32>
    %68 = vector.shape_cast %67 : vector<1x32x4xf32> to vector<32x4xf32>
    %69 = vector.extract_strided_slice %7 {offsets = [0, 57], sizes = [4, 384], strides = [1, 1]} : vector<4x512xf32> to vector<4x384xf32>
    %cst_40 = arith.constant dense<0.000000e+00> : vector<32x384xf32>
    %70 = tpu.matmul %68, %69, %cst_40 {dimension_numbers = #tpu.dot_dimension_numbers<[1], [0], [0], [1], [0, 0, 1, 1], [], []>} : vector<32x4xf32>, vector<4x384xf32>, vector<32x384xf32> -> vector<32x384xf32>
    %71 = arith.addf %66, %70 : vector<32x384xf32>
    %c13 = arith.constant 13 : index
    %c0_41 = arith.constant 0 : index
    %c0_42 = arith.constant 0 : index
    %72 = vector.load %arg2[%c13, %c0_41, %c0_42] : memref<16x32x4xf32, #tpu.memory_space<vmem>>, vector<1x32x4xf32>
    %73 = vector.shape_cast %72 : vector<1x32x4xf32> to vector<32x4xf32>
    %74 = vector.extract_strided_slice %7 {offsets = [0, 58], sizes = [4, 384], strides = [1, 1]} : vector<4x512xf32> to vector<4x384xf32>
    %cst_43 = arith.constant dense<0.000000e+00> : vector<32x384xf32>
    %75 = tpu.matmul %73, %74, %cst_43 {dimension_numbers = #tpu.dot_dimension_numbers<[1], [0], [0], [1], [0, 0, 1, 1], [], []>} : vector<32x4xf32>, vector<4x384xf32>, vector<32x384xf32> -> vector<32x384xf32>
    %76 = arith.addf %71, %75 : vector<32x384xf32>
    %c14 = arith.constant 14 : index
    %c0_44 = arith.constant 0 : index
    %c0_45 = arith.constant 0 : index
    %77 = vector.load %arg2[%c14, %c0_44, %c0_45] : memref<16x32x4xf32, #tpu.memory_space<vmem>>, vector<1x32x4xf32>
    %78 = vector.shape_cast %77 : vector<1x32x4xf32> to vector<32x4xf32>
    %79 = vector.extract_strided_slice %7 {offsets = [0, 59], sizes = [4, 384], strides = [1, 1]} : vector<4x512xf32> to vector<4x384xf32>
    %cst_46 = arith.constant dense<0.000000e+00> : vector<32x384xf32>
    %80 = tpu.matmul %78, %79, %cst_46 {dimension_numbers = #tpu.dot_dimension_numbers<[1], [0], [0], [1], [0, 0, 1, 1], [], []>} : vector<32x4xf32>, vector<4x384xf32>, vector<32x384xf32> -> vector<32x384xf32>
    %81 = arith.addf %76, %80 : vector<32x384xf32>
    %c15 = arith.constant 15 : index
    %c0_47 = arith.constant 0 : index
    %c0_48 = arith.constant 0 : index
    %82 = vector.load %arg2[%c15, %c0_47, %c0_48] : memref<16x32x4xf32, #tpu.memory_space<vmem>>, vector<1x32x4xf32>
    %83 = vector.shape_cast %82 : vector<1x32x4xf32> to vector<32x4xf32>
    %84 = vector.extract_strided_slice %7 {offsets = [0, 60], sizes = [4, 384], strides = [1, 1]} : vector<4x512xf32> to vector<4x384xf32>
    %cst_49 = arith.constant dense<0.000000e+00> : vector<32x384xf32>
    %85 = tpu.matmul %83, %84, %cst_49 {dimension_numbers = #tpu.dot_dimension_numbers<[1], [0], [0], [1], [0, 0, 1, 1], [], []>} : vector<32x4xf32>, vector<4x384xf32>, vector<32x384xf32> -> vector<32x384xf32>
    %86 = arith.addf %81, %85 : vector<32x384xf32>
    %cst_50 = arith.constant 0.000000e+00 : f32
    %87 = vector.broadcast %cst_50 : f32 to vector<32x384xf32>
    %88 = arith.maximumf %86, %87 : vector<32x384xf32>
    %c0_51 = arith.constant 0 : index
    %c0_52 = arith.constant 0 : index
    %c0_53 = arith.constant 0 : index
    %89 = vector.load %arg5[%c0_51, %c0_52, %c0_53] : memref<1x32x384xf32, #tpu.memory_space<vmem>>, vector<1x32x384xf32>
    %90 = vector.shape_cast %89 : vector<1x32x384xf32> to vector<32x384xf32>
    %91 = vector.shape_cast %88 : vector<32x384xf32> to vector<1x32x384xf32>
    tpu.vector_store %arg5[%c0_51, %c0_52, %c0_53], %91 {strides = array<i32>} : memref<1x32x384xf32, #tpu.memory_space<vmem>>, vector<1x32x384xf32>,
    %c0_54 = arith.constant 0 : index
    %c0_55 = arith.constant 0 : index
    %92 = vector.load %arg4[%c0_54, %c0_55] : memref<1x384xf32, #tpu.memory_space<vmem>>, vector<1x384xf32>
    %93 = vector.broadcast %92 : vector<1x384xf32> to vector<32x384xf32>
    %94 = arith.mulf %88, %93 : vector<32x384xf32>
    %cst_56 = arith.constant dense<0.000000e+00> : vector<32xf32>
    %95 = vector.multi_reduction <add>, %94, %cst_56 [1] : vector<32x384xf32> to vector<32xf32>
    %96 = vector.shape_cast %95 : vector<32xf32> to vector<32x1xf32>
    %97 = arith.mulf %94, %88 : vector<32x384xf32>
    %cst_57 = arith.constant dense<0.000000e+00> : vector<32xf32>
    %98 = vector.multi_reduction <add>, %97, %cst_57 [1] : vector<32x384xf32> to vector<32xf32>
    %99 = vector.shape_cast %98 : vector<32xf32> to vector<32x1xf32>
    %c0_58 = arith.constant 0 : index
    %c0_59 = arith.constant 0 : index
    %c0_60 = arith.constant 0 : index
    %100 = vector.load %arg6[%c0_58, %c0_59, %c0_60] : memref<1x32x2xf32, #tpu.memory_space<vmem>>, vector<1x32x2xf32>
    %101 = vector.shape_cast %100 : vector<1x32x2xf32> to vector<32x2xf32>
    %102 = tpu.concatenate %96, %99 in 1 : vector<32x1xf32>, vector<32x1xf32> -> vector<32x2xf32>
    %103 = arith.addf %101, %102 : vector<32x2xf32>
    %c0_61 = arith.constant 0 : index
    %c0_62 = arith.constant 0 : index
    %c0_63 = arith.constant 0 : index
    %104 = vector.load %arg6[%c0_61, %c0_62, %c0_63] : memref<1x32x2xf32, #tpu.memory_space<vmem>>, vector<1x32x2xf32>
    %105 = vector.shape_cast %104 : vector<1x32x2xf32> to vector<32x2xf32>
    %106 = vector.shape_cast %103 : vector<32x2xf32> to vector<1x32x2xf32>
    tpu.vector_store %arg6[%c0_61, %c0_62, %c0_63], %106 {strides = array<i32>} : memref<1x32x2xf32, #tpu.memory_space<vmem>>, vector<1x32x2xf32>,
    return
  }
  func.func @transform_0(%arg0: i32, %arg1: i32) -> (i32, i32, i32) {
    %c0_i32 = arith.constant 0 : i32
    %c0_i32_0 = arith.constant 0 : i32
    %c0_i32_1 = arith.constant 0 : i32
    %c0_i32_2 = arith.constant 0 : i32
    return %c0_i32, %c0_i32_0, %c0_i32_1 : i32, i32, i32
  }
  func.func @transform_1(%arg0: i32, %arg1: i32) -> (i32, i32, i32) {
    %c0_i32 = arith.constant 0 : i32
    %c0_i32_0 = arith.constant 0 : i32
    %c0_i32_1 = arith.constant 0 : i32
    return %arg0, %c0_i32, %c0_i32_0 : i32, i32, i32
  }
  func.func @transform_2(%arg0: i32, %arg1: i32) -> (i32, i32) {
    %c0_i32 = arith.constant 0 : i32
    %c0_i32_0 = arith.constant 0 : i32
    return %c0_i32, %arg1 : i32, i32
  }
  func.func @transform_3(%arg0: i32, %arg1: i32) -> (i32, i32, i32) {
    %c0_i32 = arith.constant 0 : i32
    %c0_i32_0 = arith.constant 0 : i32
    return %arg0, %c0_i32, %arg1 : i32, i32, i32
  }
  func.func @transform_4(%arg0: i32, %arg1: i32) -> (i32, i32, i32) {
    %c0_i32 = arith.constant 0 : i32
    %c0_i32_0 = arith.constant 0 : i32
    %c0_i32_1 = arith.constant 0 : i32
    return %arg0, %c0_i32, %c0_i32_0 : i32, i32, i32
  }
}

</mosaic_0001>

<bundles_post_ra>
// kernel: mixed_op_forward.1
= control target key start
LH: loop header
LB: loop body
LE: loop exit
PB: predicated region body
PF: predicated region fallthrough
CT: control target
= control target key end

     0   :  { %s3146_s15 = smov 0   ;;  %s3148_s16 = smov 0   ;;  %s4230_s0 = inlined_call_operand.vmem [shape: f32[16,32,4], index: 0, kind: input, shape index: {}]   ;;  %s4231_s1 = inlined_call_operand.vmem [shape: f32[2,4,512], index: 1, kind: input, shape index: {}]   ;;  %s4232_s2 = inlined_call_operand.vmem [shape: f32[1,384], index: 2, kind: input, shape index: {}]   ;;  %s4233_s3 = inlined_call_operand.vmem [shape: f32[2,32,384], index: 3, kind: output, shape index: {0}]   ;;  %s4234_s4 = inlined_call_operand.vmem [shape: f32[2,32,2], index: 4, kind: output, shape index: {1}]  }
   0x1   :  { %s3150_s17 = smov 0  }
   0x2 LB: > { %s27_s18 = sadd.s32 1, %s3099_s16  ;;  %p2730_p0 = scmp.ge.s32.totalorder %s3103_s17, 1  ;;  %s3103_s17 = sphi %s3150_s17, %s15_s17   ;;  %s3099_s16 = sphi %s3148_s16, %s4236_s16   ;;  %s3095_s15 = sphi %s3146_s15, %s4235_s15  }
   0x3   : > { %p29_p1 = scmp.ge.s32.totalorder %s27_s18, 2  ;;  %p189_p2 = scmp.lt.s32.totalorder %s3103_s17, 3 }
   0x5   : > { %s4238_s18 = smov (%p29_p1, %s27_s18), 0  ;;  %p190_p3 = pnand %p2730_p0, %p189_p2 }
   0x6   : > { %p228_p4 = scmp.lt.s32.totalorder (!%p190_p3), %s3095_s15, 1  ;;  %s3105_s23 = smov (!%p190_p3), 127  }
   0x7   : > { %193 = sbr.rel (%p190_p3) target bundleno = 797 (0x31d), region = 32  ;;  %s3106_s24 = smov (!%p190_p3), 126  }
   0x8   : > { %s3107_s25 = smov (!%p190_p3), 125   ;;  %s3108_s26 = smov (!%p190_p3), 109  }
   0x9   : > { %s3109_s27 = smov (!%p190_p3), 108   ;;  %s3110_s28 = smov (!%p190_p3), 107  }
   0xa   : > { %s3111_s7 = smov (!%p190_p3), 106   ;;  %s3112_s12 = smov (!%p190_p3), 90  }
   0xb   : > { %s3115_s11 = smov (!%p190_p3), 87   ;;  %s3116_s10 = smov (!%p190_p3), 70  }
   0xc   : > { %s4240_s15 = smov (!%p228_p4, %s3095_s15), 1  ;;  %vm312_vm0 = vcmask 1043456   ;;  %v3198_v27 = vld [vmem:[%s4230_s0] sm:$0xff]  ;;  %vm299_vm1 = vcmask 31744   ;;  %v3208_v30 = vld [vmem:[%s4230_s0 + $0x8] sm:$0xff]  ;;  %v3215_v33 = vld [vmem:[%s4230_s0 + $0x10] sm:$0xff] }
   0xd   : > { %s3038_s19 = sshll.u32 %s4240_s15, 4  ;;  %v3225_v37 = vld [vmem:[%s4230_s0 + $0x18] sm:$0xff]  ;;  %vm295_vm2 = vcmask 1039360   ;;  %vm537_vm3 = vcmask 1031168   ;;  %v2736_v48 = vld [vmem:[%s4230_s0 + $0x20] sm:$0xff]  ;;  %v2737_v58 = vld [vmem:[%s4230_s0 + $0x28] sm:$0xff] }
   0xe   : > { %s232_s22 = scalar_lea.vmem %s4231_s1, %s3038_s19  ;;  %s3113_s19 = smov 89   ;;  %v3254_v56 = vld [vmem:[%s4230_s0 + $0x40] sm:$0xff]  ;;  %vm678_vm4 = vcmask 1022976   ;;  %v3273_v63 = vld [vmem:[%s4230_s0 + $0x48] sm:$0xff]  ;;  %vm960_vm5 = vcmask 883712   ;;  %vm819_vm6 = vcmask 891904  }
   0xf   : > { %v3170_v0 = vld [vmem:[%s232_s22 + $0x8] sm:$0xff]  ;;  %v3172_v1 = vld [vmem:[%s232_s22] sm:$0xff]  ;;  %vm1101_vm7 = vcmask 875520   ;;  %vm1242_vm8 = vcmask 867328   ;;  %vm1524_vm9 = vcmask 728064   ;;  %vm1383_vm10 = vcmask 736256  }
  0x10   : > { %282 = vst [vmem:[#allocation1 + $0x10] ss:$2 sm:$0xff] %v3170_v0  ;;  %s3119_s5 = smov 68   ;;  %vm1665_vm11 = vcmask 719872   ;;  %vm1806_vm12 = vcmask 711680   ;;  %vm2088_vm13 = vcmask 572416  }
  0x11   : > { %280 = vst [vmem:[#allocation1] ss:$2 sm:$0xff] %v3172_v1  ;;  %vm1947_vm14 = vcmask 580608   ;;  %vm2229_vm15 = vcmask 564224   ;;  %s3040_s8 = smul.u32 96, %s4240_s15 }
  0x17   : > { %v285_v2 = vld.sshfl [vmem:[#allocation1 + $0x10] sm:$0xff pattern:$0x75316420]  ;;  %v286_v3 = vld.sshfl [vmem:[#allocation1 + $0x18] sm:$0xff pattern:$0x75316420] }
  0x18   : > { %291 = vrot.lane.b32.xlu0 %v285_v2, %s3105_s23  ;;  %v283_v4 = vld.sshfl [vmem:[#allocation1] sm:$0xff pattern:$0x75316420]  ;;  %408 = vst [vmem:[#allocation1 + $0x10] ss:$2 sm:$0xff] %v3170_v0  ;;  %v2738_v2 = vld [vmem:[%s4230_s0 + $0x30] sm:$0xff] }
  0x19   : > { %287 = vrot.lane.b32.xlu1 %v283_v4, %s3105_s23  ;;  %v284_v5 = vld.sshfl [vmem:[#allocation1 + $0x8] sm:$0xff pattern:$0x75316420] }
  0x1a   : > { %406 = vst [vmem:[#allocation1] ss:$2 sm:$0xff] %v3172_v1 }
  0x1f   : > { %v3178_v6 = vld.sshfl [vmem:[#allocation1 + $0x10] sm:$0xff pattern:$0x75316420] }
  0x20   : > { %293 = vrot.lane.b32.xlu0 %v286_v3, %s3105_s23  ;;  %524 = vst [vmem:[#allocation1 + $0x10] ss:$2 sm:$0xff] %v3170_v0 }
  0x21   : > { %289 = vrot.lane.b32.xlu1 %v284_v5, %s3105_s23  ;;  %v409_v7 = vld.sshfl [vmem:[#allocation1] sm:$0xff pattern:$0x75316420]  ;;  %v3181_v8 = vld.sshfl [vmem:[#allocation1 + $0x8] sm:$0xff pattern:$0x75316420] }
  0x22   : > { %522 = vst [vmem:[#allocation1] ss:$2 sm:$0xff] %v3172_v1  ;;  %2755 = vmatpush.msk.msra.mxu3 %vm312_vm0, %v409_v7 }
  0x23   : > { %2756 = vmatmul.msk.f32.vlgmr.msra.gmra.mxu3 %vm299_vm1, %v3198_v27 }
  0x27   : > { %v527_v9 = vld.sshfl [vmem:[#allocation1 + $0x10] sm:$0xff pattern:$0x75316420]  ;;  %v528_v10 = vld.sshfl [vmem:[#allocation1 + $0x18] sm:$0xff pattern:$0x75316420] }
  0x28   : > { %533 = vrot.lane.b32.xlu0 %v527_v9, %s3106_s24  ;;  %665 = vst [vmem:[#allocation1 + $0x10] ss:$2 sm:$0xff] %v3170_v0 }
  0x29   : > { %v525_v11 = vld.sshfl [vmem:[#allocation1] sm:$0xff pattern:$0x75316420]  ;;  %v526_v12 = vld.sshfl [vmem:[#allocation1 + $0x8] sm:$0xff pattern:$0x75316420] }
  0x2a   : > { %529 = vrot.lane.b32.xlu2 %v525_v11, %s3106_s24  ;;  %663 = vst [vmem:[#allocation1] ss:$2 sm:$0xff] %v3172_v1 }
  0x2b   : > { %2757 = vmatmul.msk.f32.gmra.mxu3 %vm299_vm1, %v3208_v30 }
  0x2f   : > { %v669_v13 = vld.sshfl [vmem:[#allocation1 + $0x18] sm:$0xff pattern:$0x75316420]  ;;  %v668_v14 = vld.sshfl [vmem:[#allocation1 + $0x10] sm:$0xff pattern:$0x75316420] }
  0x30   : > { %676 = vrot.lane.b32.xlu0 %v669_v13, %s3107_s25  ;;  %806 = vst [vmem:[#allocation1 + $0x10] ss:$2 sm:$0xff] %v3170_v0 }
  0x31   : > { %v667_v15 = vld.sshfl [vmem:[#allocation1 + $0x8] sm:$0xff pattern:$0x75316420]  ;;  %v666_v16 = vld.sshfl [vmem:[#allocation1] sm:$0xff pattern:$0x75316420] }
  0x32   : > { %672 = vrot.lane.b32.xlu1 %v667_v15, %s3107_s25  ;;  %804 = vst [vmem:[#allocation1] ss:$2 sm:$0xff] %v3172_v1  ;;  %531 = vrot.lane.b32.xlu2 %v526_v12, %s3106_s24  ;;  %v2739_v12 = vld [vmem:[%s4230_s0 + $0x38] sm:$0xff] }
  0x33   : > { %2758 = vmatmul.msk.f32.gmra.mxu3 %vm299_vm1, %v3215_v33  ;;  %v3308_v15 = vld [vmem:[%s4230_s0 + $0x58] sm:$0xff] }
  0x37   : > { %v809_v17 = vld.sshfl [vmem:[#allocation1 + $0x10] sm:$0xff pattern:$0x75316420]  ;;  %v810_v18 = vld.sshfl [vmem:[#allocation1 + $0x18] sm:$0xff pattern:$0x75316420] }
  0x38   : > { %815 = vrot.lane.b32.xlu0 %v809_v17, %s3108_s26  ;;  %947 = vst [vmem:[#allocation1 + $0x10] ss:$2 sm:$0xff] %v3170_v0 }
  0x39   : > { %v807_v19 = vld.sshfl [vmem:[#allocation1] sm:$0xff pattern:$0x75316420]  ;;  %v808_v20 = vld.sshfl [vmem:[#allocation1 + $0x8] sm:$0xff pattern:$0x75316420] }
  0x3a   : > { %535 = vrot.lane.b32.xlu1 %v528_v10, %s3106_s24  ;;  %674 = vrot.lane.b32.xlu2 %v668_v14, %s3107_s25  ;;  %945 = vst [vmem:[#allocation1] ss:$2 sm:$0xff] %v3172_v1  ;;  %s3114_s24 = smov 88   ;;  %v3292_v10 = vld [vmem:[%s4230_s0 + $0x50] sm:$0xff] }
  0x3b   : > { %2759 = vmatmul.msk.f32.gmra.mxu3 %vm299_vm1, %v3225_v37 }
  0x3f   : > { %v950_v25 = vld.sshfl [vmem:[#allocation1 + $0x10] sm:$0xff pattern:$0x75316420]  ;;  %v951_v26 = vld.sshfl [vmem:[#allocation1 + $0x18] sm:$0xff pattern:$0x75316420] }
  0x40   : > { %1088 = vst [vmem:[#allocation1 + $0x10] ss:$2 sm:$0xff] %v3170_v0 }
  0x41   : > { %v949_v21 = vld.sshfl [vmem:[#allocation1 + $0x8] sm:$0xff pattern:$0x75316420]  ;;  %v948_v22 = vld.sshfl [vmem:[#allocation1] sm:$0xff pattern:$0x75316420] }
  0x42   : > { %954 = vrot.lane.b32.xlu0 %v949_v21, %s3109_s27  ;;  %1086 = vst [vmem:[#allocation1] ss:$2 sm:$0xff] %v3172_v1  ;;  %670 = vrot.lane.b32.xlu2 %v666_v16, %s3107_s25 }
  0x43   : > { %817 = vrot.lane.b32.xlu1 %v810_v18, %s3108_s26 }
  0x47   : > { %v1091_v28 = vld.sshfl [vmem:[#allocation1 + $0x10] sm:$0xff pattern:$0x75316420]  ;;  %v1092_v29 = vld.sshfl [vmem:[#allocation1 + $0x18] sm:$0xff pattern:$0x75316420] }
  0x48   : > { %1229 = vst [vmem:[#allocation1 + $0x10] ss:$2 sm:$0xff] %v3170_v0 }
  0x49   : > { %v1089_v23 = vld.sshfl [vmem:[#allocation1] sm:$0xff pattern:$0x75316420]  ;;  %v1090_v24 = vld.sshfl [vmem:[#allocation1 + $0x8] sm:$0xff pattern:$0x75316420] }
  0x4a   : > { %1093 = vrot.lane.b32.xlu0 %v1089_v23, %s3110_s28  ;;  %952 = vrot.lane.b32.xlu2 %v948_v22, %s3109_s27  ;;  %1227 = vst [vmem:[#allocation1] ss:$2 sm:$0xff] %v3172_v1  ;;  %v2789_v23 = vld [vmem:[%s4230_s0 + $0x60] sm:$0xff] }
  0x4b   : > { %811 = vrot.lane.b32.xlu1 %v807_v19, %s3108_s26 }
  0x4f   : > { %v1232_v32 = vld.sshfl [vmem:[#allocation1 + $0x10] sm:$0xff pattern:$0x75316420]  ;;  %v1233_v35 = vld.sshfl [vmem:[#allocation1 + $0x18] sm:$0xff pattern:$0x75316420] }
  0x50   : > { %1370 = vst [vmem:[#allocation1 + $0x10] ss:$2 sm:$0xff] %v3170_v0 }
  0x51   : > { %v1231_v31 = vld.sshfl [vmem:[#allocation1 + $0x8] sm:$0xff pattern:$0x75316420]  ;;  %v1230_v36 = vld.sshfl [vmem:[#allocation1] sm:$0xff pattern:$0x75316420] }
  0x52   : > { %956 = vrot.lane.b32.xlu0 %v950_v25, %s3109_s27  ;;  %813 = vrot.lane.b32.xlu2 %v808_v20, %s3108_s26  ;;  %1368 = vst [vmem:[#allocation1] ss:$2 sm:$0xff] %v3172_v1 }
  0x53   : > { %1095 = vrot.lane.b32.xlu1 %v1090_v24, %s3110_s28 }
  0x57   : > { %v1373_v43 = vld.sshfl [vmem:[#allocation1 + $0x10] sm:$0xff pattern:$0x75316420]  ;;  %v1374_v44 = vld.sshfl [vmem:[#allocation1 + $0x18] sm:$0xff pattern:$0x75316420] }
  0x58   : > { %1511 = vst [vmem:[#allocation1 + $0x10] ss:$2 sm:$0xff] %v3170_v0 }
  0x59   : > { %v1371_v40 = vld.sshfl [vmem:[#allocation1] sm:$0xff pattern:$0x75316420]  ;;  %v1372_v41 = vld.sshfl [vmem:[#allocation1 + $0x8] sm:$0xff pattern:$0x75316420] }
  0x5a   : > { %1097 = vrot.lane.b32.xlu2 %v1091_v28, %s3110_s28  ;;  %1238 = vrot.lane.b32.xlu0 %v1232_v32, %s3111_s7  ;;  %1509 = vst [vmem:[#allocation1] ss:$2 sm:$0xff] %v3172_v1  ;;  %v2792_v32 = vld [vmem:[%s4230_s0 + $0x78] sm:$0xff] }
  0x5b   : > { %958 = vrot.lane.b32.xlu1 %v951_v26, %s3109_s27 }
  0x5f   : > { %v1514_v7 = vld.sshfl [vmem:[#allocation1 + $0x10] sm:$0xff pattern:$0x75316420] }
  0x61   : > { %v1513_v53 = vld.sshfl [vmem:[#allocation1 + $0x8] sm:$0xff pattern:$0x75316420]  ;;  %v1512_v54 = vld.sshfl [vmem:[#allocation1] sm:$0xff pattern:$0x75316420] }
  0x62   : > { %1236 = vrot.lane.b32.xlu2 %v1231_v31, %s3111_s7  ;;  %1234 = vrot.lane.b32.xlu0 %v1230_v36, %s3111_s7  ;;  %1650 = vst [vmem:[#allocation1] ss:$2 sm:$0xff] %v3172_v1 }
  0x63   : > { %1240 = vrot.lane.b32.xlu1 %v1233_v35, %s3111_s7 }
  0x69   : > { %v1653_v59 = vld.sshfl [vmem:[#allocation1] sm:$0xff pattern:$0x75316420]  ;;  %v1654_v60 = vld.sshfl [vmem:[#allocation1 + $0x8] sm:$0xff pattern:$0x75316420] }
  0x6a   : > { %1099 = vrot.lane.b32.xlu2 %v1092_v29, %s3110_s28  ;;  %1516 = vrot.lane.b32.xlu0 %v1512_v54, %s3113_s19  ;;  %1791 = vst [vmem:[#allocation1] ss:$2 sm:$0xff] %v3172_v1  ;;  %s3118_s28 = smov 69  }
  0x6b   : > { %1379 = vrot.lane.b32.xlu1 %v1373_v43, %s3112_s12  ;;  %v3392_v43 = vld [vmem:[%s4230_s0 + $0xa8] sm:$0xff] }
  0x71   : > { %v1795_v26 = vld.sshfl [vmem:[#allocation1 + $0x8] sm:$0xff pattern:$0x75316420] }
  0x72   : > { %1381 = vrot.lane.b32.xlu2 %v1374_v44, %s3112_s12  ;;  %1377 = vrot.lane.b32.xlu0 %v1372_v41, %s3112_s12  ;;  %v1794_v41 = vld.sshfl [vmem:[#allocation1] sm:$0xff pattern:$0x75316420] }
  0x73   : > { %1518 = vrot.lane.b32.xlu1 %v1513_v53, %s3113_s19  ;;  %1932 = vst [vmem:[#allocation1] ss:$2 sm:$0xff] %v3172_v1 }
  0x7a   : > { %1375 = vrot.lane.b32.xlu2 %v1371_v40, %s3112_s12  ;;  %v1935_v44 = vld.sshfl [vmem:[#allocation1] sm:$0xff pattern:$0x75316420]  ;;  %s4138_s12 = scalar_lea.vmem %s4233_s3, %s3040_s8 }
  0x7b   : > { %1657 = vrot.lane.b32.xlu1 %v1653_v59, %s3114_s24  ;;  %v3436_v59 = vld [vmem:[%s4230_s0 + $0xc0] sm:$0xff] }
  0x82   : > { %1659 = vrot.lane.b32.xlu2 %v1654_v60, %s3114_s24 }
  0x83   : > { %1520 = vrot.lane.b32.xlu1 %v1514_v7, %s3113_s19 }
  0x84   : > { %v530_v34 = vpop.permute.xlu2 %529 }
  0x8a   : > { %v292_v38 = vpop.permute.xlu0 %291 }
  0x8b   : > { %v288_v39 = vpop.permute.xlu1 %287 }
  0x8c   : > { %v532_v42 = vpop.permute.xlu2 %531 }
  0x8d   : > { %v538_v51 = vsel %vm537_vm3, %v530_v34, %v532_v42 }
  0x92   : > { %v294_v45 = vpop.permute.xlu0 %293 }
  0x93   : > { %v290_v46 = vpop.permute.xlu1 %289  ;;  %v298_v47 = vsel %vm295_vm2, %v292_v38, %v294_v45  ;;  %v1936_v45 = vld.sshfl [vmem:[#allocation1 + $0x8] sm:$0xff pattern:$0x75316420] }
  0x94   : > { %v296_v49 = vsel %vm295_vm2, %v288_v39, %v290_v46  ;;  %v297_v50 = vsel %vm295_vm2, %v290_v46, %v292_v38  ;;  %2750 = vmatpush.msk.msra.mxu2 %vm312_vm0, %v298_v47  ;;  %v675_v52 = vpop.permute.xlu2 %674  ;;  %v3377_v39 = vld [vmem:[%s4230_s0 + $0xa0] sm:$0xff]  ;;  %2073 = vst [vmem:[#allocation1] ss:$2 sm:$0xff] %v3172_v1  ;;  %v3405_v47 = vld [vmem:[%s4230_s0 + $0xb0] sm:$0xff]  ;;  %vm2370_vm2 = vcmask 556032  }
  0x95   : > { %2740 = vmatpush.msk.msra.mxu0 %vm312_vm0, %v296_v49  ;;  %2745 = vmatpush.msk.msra.mxu1 %vm312_vm0, %v297_v50  ;;  %v3416_v50 = vld [vmem:[%s4230_s0 + $0xb8] sm:$0xff] }
  0x96   : > { %2741 = vmatmul.msk.f32.vlgmr.msra.gmra.mxu0 %vm299_vm1, %v2736_v48  ;;  %2746 = vmatmul.msk.f32.vlgmr.msra.gmra.mxu1 %vm299_vm1, %v2736_v48 }
  0x97   : > { %2751 = vmatmul.msk.f32.vlgmr.msra.gmra.mxu2 %vm299_vm1, %v2736_v48  ;;  %2760 = vmatpush.msk.msrb.mxu0 %vm312_vm0, %v3181_v8  ;;  %v1515_v8 = vld.sshfl [vmem:[#allocation1 + $0x18] sm:$0xff pattern:$0x75316420] }
  0x98   : > { %2774 = vmatpush.msk.msrb.mxu2 %vm312_vm0, %v538_v51  ;;  %2765 = vmatpush.msk.msrb.mxu1 %vm312_vm0, %v3178_v6  ;;  %1652 = vst [vmem:[#allocation1 + $0x10] ss:$2 sm:$0xff] %v3170_v0  ;;  %v2808_v51 = vld [vmem:[%s4230_s0 + $0x80] sm:$0xff] }
  0x99   : > { %1522 = vrot.lane.b32.xlu2 %v1515_v8, %s3113_s19  ;;  %s3117_s19 = smov 71   ;;  %v2811_v8 = vld [vmem:[%s4230_s0 + $0x98] sm:$0xff] }
  0x9a   : > { %v534_v55 = vpop.permute.xlu0 %533 }
  0x9b   : > { %v539_v57 = vsel %vm537_vm3, %v532_v42, %v534_v55  ;;  %v2076_v60 = vld.sshfl [vmem:[#allocation1] sm:$0xff pattern:$0x75316420] }
  0x9c   : > { %2779 = vmatpush.msk.msrb.mxu3 %vm312_vm0, %v539_v57  ;;  %v671_v61 = vpop.permute.xlu2 %670 }
  0x9d   : > { %2780 = vmatmul.msk.f32.vlgmr.msrb.gmra.mxu3 %vm299_vm1, %v3254_v56 }
  0x9e   : > { %2742 = vmatmul.msk.f32.gmra.mxu0 %vm299_vm1, %v2737_v58  ;;  %2747 = vmatmul.msk.f32.gmra.mxu1 %vm299_vm1, %v2737_v58 }
  0x9f   : > { %2752 = vmatmul.msk.f32.gmra.mxu2 %vm299_vm1, %v2737_v58  ;;  %v1655_v22 = vld.sshfl [vmem:[#allocation1 + $0x10] sm:$0xff pattern:$0x75316420]  ;;  %v1656_v28 = vld.sshfl [vmem:[#allocation1 + $0x18] sm:$0xff pattern:$0x75316420] }
  0xa0   : > { %1661 = vrot.lane.b32.xlu0 %v1655_v22, %s3114_s24  ;;  %1793 = vst [vmem:[#allocation1 + $0x10] ss:$2 sm:$0xff] %v3170_v0 }
  0xa2   : > { %v677_v62 = vpop.permute.xlu0 %676 }
  0xa3   : > { %v681_v3 = vsel %vm678_vm4, %v675_v52, %v677_v62 }
  0xa4   : > { %v673_v4 = vpop.permute.xlu1 %672  ;;  %2803 = vmatpush.msk.msra.mxu3 %vm312_vm0, %v681_v3  ;;  %v953_v9 = vpop.permute.xlu2 %952  ;;  %v2810_v3 = vld [vmem:[%s4230_s0 + $0x90] sm:$0xff] }
  0xa5   : > { %v680_v5 = vsel %vm678_vm4, %v673_v4, %v675_v52  ;;  %v679_v6 = vsel %vm678_vm4, %v671_v61, %v673_v4  ;;  %2781 = vmatmul.msk.f32.gmra.mxu3 %vm299_vm1, %v3273_v63  ;;  %v2809_v61 = vld [vmem:[%s4230_s0 + $0x88] sm:$0xff] }
  0xa6   : > { %2743 = vmatmul.msk.f32.gmra.mxu0 %vm299_vm1, %v2738_v2  ;;  %2748 = vmatmul.msk.f32.gmra.mxu1 %vm299_vm1, %v2738_v2  ;;  %v3425_v54 = vpop.f32.mrf.mxu3 }
  0xa7   : > { %2753 = vmatmul.msk.f32.gmra.mxu2 %vm299_vm1, %v2738_v2  ;;  %2793 = vmatpush.msk.msra.mxu1 %vm312_vm0, %v679_v6  ;;  %v1796_v38 = vld.sshfl [vmem:[#allocation1 + $0x10] sm:$0xff pattern:$0x75316420]  ;;  %v1797_v62 = vld.sshfl [vmem:[#allocation1 + $0x18] sm:$0xff pattern:$0x75316420] }
  0xa8   : > { %2798 = vmatpush.msk.msra.mxu2 %vm312_vm0, %v680_v5  ;;  %1800 = vrot.lane.b32.xlu0 %v1795_v26, %s3115_s11  ;;  %1934 = vst [vmem:[#allocation1 + $0x10] ss:$2 sm:$0xff] %v3170_v0  ;;  %v3454_v2 = vld [vmem:[%s4230_s0 + $0xc8] sm:$0xff]  ;;  %v3467_v6 = vld [vmem:[%s4230_s0 + $0xd0] sm:$0xff] }
  0xa9   : > { %1802 = vrot.lane.b32.xlu1 %v1796_v38, %s3115_s11  ;;  %1804 = vrot.lane.b32.xlu2 %v1797_v62, %s3115_s11 }
  0xaa   : > { %v816_v11 = vpop.permute.xlu0 %815 }
  0xac   : > { %v536_v13 = vpop.permute.xlu1 %535  ;;  %v814_v16 = vpop.permute.xlu2 %813 }
  0xad   : > { %v540_v14 = vsel %vm537_vm3, %v534_v55, %v536_v13  ;;  %2782 = vmatmul.msk.f32.gmra.mxu3 %vm299_vm1, %v3292_v10  ;;  %v821_v20 = vsel %vm819_vm6, %v814_v16, %v816_v11  ;;  %v3488_v13 = vld [vmem:[%s4230_s0 + $0xd8] sm:$0xff] }
  0xae   : > { %2784 = vmatpush.msk.msra.mxu0 %vm312_vm0, %v540_v14  ;;  %2749 = vmatmul.msk.f32.gmra.mxu1 %vm299_vm1, %v2739_v12 }
  0xaf   : > { %2744 = vmatmul.msk.f32.gmra.mxu0 %vm299_vm1, %v2739_v12  ;;  %2754 = vmatmul.msk.f32.gmra.mxu2 %vm299_vm1, %v2739_v12  ;;  %v1938_v4 = vld.sshfl [vmem:[#allocation1 + $0x18] sm:$0xff pattern:$0x75316420]  ;;  %v1937_v7 = vld.sshfl [vmem:[#allocation1 + $0x10] sm:$0xff pattern:$0x75316420] }
  0xb0   : > { %1663 = vrot.lane.b32.xlu0 %v1656_v28, %s3114_s24  ;;  %2075 = vst [vmem:[#allocation1 + $0x10] ss:$2 sm:$0xff] %v3170_v0 }
  0xb1   : > { %1798 = vrot.lane.b32.xlu1 %v1794_v41, %s3115_s11  ;;  %1943 = vrot.lane.b32.xlu2 %v1937_v7, %s3117_s19  ;;  %v2867_v41 = vld [vmem:[%s4230_s0 + $0xf0] sm:$0xff]  ;;  %s3039_s11 = sshll.u32 %s4240_s15, 5 }
  0xb2   : > { %s4195_s21 = scalar_lea.vmem %s4234_s4, %s3039_s11 }
  0xb4   : > { %v955_v17 = vpop.permute.xlu0 %954  ;;  %v1098_v34 = vpop.permute.xlu2 %1097 }
  0xb5   : > { %2783 = vmatmul.msk.f32.gmra.mxu3 %vm299_vm1, %v3308_v15  ;;  %v961_v18 = vsel %vm960_vm5, %v953_v9, %v955_v17  ;;  %v818_v19 = vpop.permute.xlu1 %817 }
  0xb6   : > { %2766 = vmatmul.msk.f32.vlgmr.msrb.gmra.mxu1 %vm299_vm1, %v3198_v27  ;;  %v822_v21 = vsel %vm819_vm6, %v816_v11, %v818_v19  ;;  %2831 = vmatpush.msk.msrb.mxu3 %vm312_vm0, %v961_v18  ;;  %v2077_v19 = vld.sshfl [vmem:[#allocation1 + $0x8] sm:$0xff pattern:$0x75316420] }
  0xb7   : > { %2761 = vmatmul.msk.f32.vlgmr.msrb.gmra.mxu0 %vm299_vm1, %v3198_v27  ;;  %2775 = vmatmul.msk.f32.vlgmr.msrb.gmra.mxu2 %vm299_vm1, %v3254_v56  ;;  %v2790_v27 = vld [vmem:[%s4230_s0 + $0x68] sm:$0xff]  ;;  %v2078_v14 = vld.sshfl [vmem:[#allocation1 + $0x10] sm:$0xff pattern:$0x75316420]  ;;  %2214 = vst [vmem:[#allocation1] ss:$2 sm:$0xff] %v3172_v1 }
  0xb8   : > { %2817 = vmatpush.msk.msrb.mxu1 %vm312_vm0, %v821_v20  ;;  %2822 = vmatpush.msk.msrb.mxu2 %vm312_vm0, %v822_v21 }
  0xb9   : > { %2080 = vrot.lane.b32.xlu1 %v2076_v60, %s3116_s10  ;;  %1945 = vrot.lane.b32.xlu0 %v1938_v4, %s3117_s19 }
  0xba   : > { %2082 = vrot.lane.b32.xlu2 %v2077_v19, %s3116_s10 }
  0xbc   : > { %v1094_v29 = vpop.permute.xlu0 %1093  ;;  %v1237_v46 = vpop.permute.xlu2 %1236 }
  0xbd   : > { %2804 = vmatmul.msk.f32.vlgmr.msra.gmra.mxu3 %vm299_vm1, %v2789_v23  ;;  %v812_v24 = vpop.permute.xlu1 %811 }
  0xbe   : > { %2767 = vmatmul.msk.f32.gmra.mxu1 %vm299_vm1, %v3208_v30  ;;  %v820_v25 = vsel %vm819_vm6, %v812_v24, %v814_v16 }
  0xbf   : > { %2762 = vmatmul.msk.f32.gmra.mxu0 %vm299_vm1, %v3208_v30  ;;  %2776 = vmatmul.msk.f32.gmra.mxu2 %vm299_vm1, %v3273_v63  ;;  %v2791_v30 = vld [vmem:[%s4230_s0 + $0x70] sm:$0xff] }
  0xc0   : > { %2812 = vmatpush.msk.msrb.mxu0 %vm312_vm0, %v820_v25  ;;  %v2865_v25 = vld [vmem:[%s4230_s0 + $0xe0] sm:$0xff] }
  0xc1   : > { %1941 = vrot.lane.b32.xlu1 %v1936_v45, %s3117_s19  ;;  %1939 = vrot.lane.b32.xlu0 %v1935_v44, %s3117_s19 }
  0xc4   : > { %v957_v31 = vpop.permute.xlu0 %956  ;;  %v1100_v49 = vpop.permute.xlu2 %1099 }
  0xc5   : > { %2805 = vmatmul.msk.f32.gmra.mxu3 %vm299_vm1, %v2790_v27  ;;  %v1096_v35 = vpop.permute.xlu1 %1095  ;;  %v1104_v52 = vsel %vm1101_vm7, %v1098_v34, %v1100_v49 }
  0xc6   : > { %2768 = vmatmul.msk.f32.gmra.mxu1 %vm299_vm1, %v3215_v33  ;;  %v1102_v36 = vsel %vm1101_vm7, %v1094_v29, %v1096_v35  ;;  %v2217_v29 = vld.sshfl [vmem:[#allocation1] sm:$0xff pattern:$0x75316420] }
  0xc7   : > { %2763 = vmatmul.msk.f32.gmra.mxu0 %vm299_vm1, %v3215_v33  ;;  %2777 = vmatmul.msk.f32.gmra.mxu2 %vm299_vm1, %v3292_v10  ;;  %v962_v33 = vsel %vm960_vm5, %v955_v17, %v957_v31 }
  0xc8   : > { %2221 = vrot.lane.b32.xlu2 %v2217_v29, %s3118_s28 }
  0xcc   : > { %v1239_v48 = vpop.permute.xlu0 %1238  ;;  %v1382_v16 = vpop.permute.xlu2 %1381 }
  0xcd   : > { %2806 = vmatmul.msk.f32.gmra.mxu3 %vm299_vm1, %v2791_v30  ;;  %v959_v40 = vpop.permute.xlu1 %958  ;;  %v1244_v53 = vsel %vm1242_vm8, %v1237_v46, %v1239_v48 }
  0xce   : > { %2769 = vmatmul.msk.f32.gmra.mxu1 %vm299_vm1, %v3225_v37  ;;  %v963_v42 = vsel %vm960_vm5, %v957_v31, %v959_v40 }
  0xcf   : > { %2764 = vmatmul.msk.f32.gmra.mxu0 %vm299_vm1, %v3225_v37  ;;  %2778 = vmatmul.msk.f32.gmra.mxu2 %vm299_vm1, %v3308_v15  ;;  %v1103_v37 = vsel %vm1101_vm7, %v1096_v35, %v1098_v34 }
  0xd0   : > { %2855 = vmatpush.msk.msra.mxu3 %vm312_vm0, %v1103_v37  ;;  %2084 = vrot.lane.b32.xlu2 %v2078_v14, %s3116_s10 }
  0xd4   : > { %v1376_v31 = vpop.permute.xlu2 %1375 }
  0xd5   : > { %2807 = vmatmul.msk.f32.gmra.mxu3 %vm299_vm1, %v2792_v32  ;;  %v1241_v55 = vpop.permute.xlu1 %1240 }
  0xd6   : > { %2794 = vmatmul.msk.f32.vlgmr.msra.gmra.mxu1 %vm299_vm1, %v2789_v23  ;;  %v1245_v57 = vsel %vm1242_vm8, %v1239_v48, %v1241_v55 }
  0xd7   : > { %2785 = vmatmul.msk.f32.vlgmr.msra.gmra.mxu0 %vm299_vm1, %v3254_v56  ;;  %2799 = vmatmul.msk.f32.vlgmr.msra.gmra.mxu2 %vm299_vm1, %v2789_v23  ;;  %v1235_v56 = vpop.permute.xlu0 %1234 }
  0xd8   : > { %2836 = vmatpush.msk.msra.mxu0 %vm312_vm0, %v962_v33  ;;  %2850 = vmatpush.msk.msra.mxu2 %vm312_vm0, %v1102_v36  ;;  %v1243_v58 = vsel %vm1242_vm8, %v1235_v56, %v1237_v46 }
  0xd9   : > { %2841 = vmatpush.msk.msra.mxu1 %vm312_vm0, %v963_v42 }
  0xdc   : > { %v1660_v55 = vpop.permute.xlu2 %1659 }
  0xdd   : > { %2832 = vmatmul.msk.f32.vlgmr.msrb.gmra.mxu3 %vm299_vm1, %v3377_v39  ;;  %v1380_v5 = vpop.permute.xlu1 %1379 }
  0xde   : > { %2795 = vmatmul.msk.f32.gmra.mxu1 %vm299_vm1, %v2790_v27  ;;  %2879 = vmatpush.msk.msrb.mxu3 %vm312_vm0, %v1245_v57  ;;  %v1386_v20 = vsel %vm1383_vm10, %v1380_v5, %v1382_v16 }
  0xdf   : > { %2786 = vmatmul.msk.f32.gmra.mxu0 %vm299_vm1, %v3273_v63  ;;  %2800 = vmatmul.msk.f32.gmra.mxu2 %vm299_vm1, %v2790_v27  ;;  %v3449_v63 = vpop.f32.mrf.mxu3  ;;  %v1517_v11 = vpop.permute.xlu0 %1516 }
  0xe5   : > { %2833 = vmatmul.msk.f32.gmra.mxu3 %vm299_vm1, %v3392_v43 }
  0xe6   : > { %2796 = vmatmul.msk.f32.gmra.mxu1 %vm299_vm1, %v2791_v30 }
  0xe7   : > { %2787 = vmatmul.msk.f32.gmra.mxu0 %vm299_vm1, %v3292_v10  ;;  %2801 = vmatmul.msk.f32.gmra.mxu2 %vm299_vm1, %v2791_v30  ;;  %v3472_v9 = vpop.f32.mrf.mxu3  ;;  %v3475_v10 = vpop.permute.xlu1 %1518  ;;  %v2218_v30 = vld.sshfl [vmem:[#allocation1 + $0x8] sm:$0xff pattern:$0x75316420] }
  0xe8   : > { %v1525_v12 = vsel %vm1524_vm9, %v1517_v11, %v3475_v10  ;;  %v1378_v21 = vpop.permute.xlu0 %1377  ;;  %2355 = vst [vmem:[#allocation1] ss:$2 sm:$0xff] %v3172_v1  ;;  %2223 = vrot.lane.b32.xlu0 %v2218_v30, %s3118_s28  ;;  %v2866_v1 = vld [vmem:[%s4230_s0 + $0xe8] sm:$0xff] }
  0xe9   : > { %v1385_v23 = vsel %vm1383_vm10, %v1378_v21, %v1380_v5  ;;  %v3620_v11 = vld [vmem:[%s4230_s0 + $0x128] sm:$0xff] }
  0xed   : > { %2834 = vmatmul.msk.f32.gmra.mxu3 %vm299_vm1, %v3405_v47 }
  0xee   : > { %2797 = vmatmul.msk.f32.gmra.mxu1 %vm299_vm1, %v2792_v32 }
  0xef   : > { %2788 = vmatmul.msk.f32.gmra.mxu0 %vm299_vm1, %v3308_v15  ;;  %2802 = vmatmul.msk.f32.gmra.mxu2 %vm299_vm1, %v2792_v32  ;;  %v2079_v15 = vld.sshfl [vmem:[#allocation1 + $0x18] sm:$0xff pattern:$0x75316420]  ;;  %v3502_v22 = vpop.f32.mrf.mxu3  ;;  %v1384_v32 = vsel %vm1383_vm10, %v1376_v31, %v1378_v21  ;;  %v2359_v37 = vld.sshfl [vmem:[#allocation1 + $0x8] sm:$0xff pattern:$0x75316420]  ;;  %v1658_v38 = vpop.permute.xlu1 %1657 }
  0xf0   : > { %2216 = vst [vmem:[#allocation1 + $0x10] ss:$2 sm:$0xff] %v3170_v0  ;;  %2086 = vrot.lane.b32.xlu0 %v2079_v15, %s3116_s10  ;;  %v1666_v57 = vsel %vm1665_vm11, %v1658_v38, %v1660_v55 }
  0xf3   : > { %v1523_v5 = vpop.permute.xlu2 %1522 }
  0xf5   : > { %2835 = vmatmul.msk.f32.gmra.mxu3 %vm299_vm1, %v3416_v50 }
  0xf6   : > { %2818 = vmatmul.msk.f32.vlgmr.msrb.gmra.mxu1 %vm299_vm1, %v2808_v51 }
  0xf7   : > { %2813 = vmatmul.msk.f32.vlgmr.msrb.gmra.mxu0 %vm299_vm1, %v2808_v51  ;;  %2823 = vmatmul.msk.f32.vlgmr.msrb.gmra.mxu2 %vm299_vm1, %v2808_v51  ;;  %v2219_v28 = vld.sshfl [vmem:[#allocation1 + $0x10] sm:$0xff pattern:$0x75316420] }
  0xf8   : > { %2860 = vmatpush.msk.msrb.mxu0 %vm312_vm0, %v1104_v52  ;;  %2874 = vmatpush.msk.msrb.mxu2 %vm312_vm0, %v1244_v53 }
  0xf9   : > { %2869 = vmatpush.msk.msrb.mxu1 %vm312_vm0, %v1243_v58  ;;  %2225 = vrot.lane.b32.xlu1 %v2219_v28, %s3118_s28 }
  0xfd   : > { %2856 = vmatmul.msk.f32.vlgmr.msra.gmra.mxu3 %vm299_vm1, %v3436_v59 }
  0xfe   : > { %2819 = vmatmul.msk.f32.gmra.mxu1 %vm299_vm1, %v2809_v61  ;;  %2907 = vmatpush.msk.msra.mxu3 %vm312_vm0, %v1525_v12 }
  0xff   : > { %2814 = vmatmul.msk.f32.gmra.mxu0 %vm299_vm1, %v2809_v61  ;;  %2824 = vmatmul.msk.f32.gmra.mxu2 %vm299_vm1, %v2809_v61 }
 0x101   : > { %2364 = vrot.lane.b32.xlu1 %v2359_v37, %s3119_s5  ;;  %v2884_v37 = vld [vmem:[%s4230_s0 + $0x100] sm:$0xff] }
 0x105   : > { %2857 = vmatmul.msk.f32.gmra.mxu3 %vm299_vm1, %v3454_v2 }
 0x106   : > { %2820 = vmatmul.msk.f32.gmra.mxu1 %vm299_vm1, %v2810_v3 }
 0x107   : > { %2815 = vmatmul.msk.f32.gmra.mxu0 %vm299_vm1, %v2810_v3  ;;  %2825 = vmatmul.msk.f32.gmra.mxu2 %vm299_vm1, %v2810_v3 }
 0x10d   : > { %2858 = vmatmul.msk.f32.gmra.mxu3 %vm299_vm1, %v3467_v6 }
 0x10e   : > { %2821 = vmatmul.msk.f32.gmra.mxu1 %vm299_vm1, %v2811_v8 }
 0x10f   : > { %2816 = vmatmul.msk.f32.gmra.mxu0 %vm299_vm1, %v2811_v8  ;;  %2826 = vmatmul.msk.f32.gmra.mxu2 %vm299_vm1, %v2811_v8 }
 0x112   : > { %v3587_v53 = vpop.permute.xlu0 %1661 }
 0x113   : > { %v3490_v17 = vpop.f32.mrf.mxu0  ;;  %v3492_v18 = vpop.f32.mrf.mxu1  ;;  %v1667_v58 = vsel %vm1665_vm11, %v1660_v55, %v3587_v53  ;;  %v2885_v55 = vld [vmem:[%s4230_s0 + $0x108] sm:$0xff] }
 0x115   : > { %2859 = vmatmul.msk.f32.gmra.mxu3 %vm299_vm1, %v3488_v13 }
 0x116   : > { %2842 = vmatmul.msk.f32.vlgmr.msra.gmra.mxu1 %vm299_vm1, %v3377_v39 }
 0x117   : > { %2837 = vmatmul.msk.f32.vlgmr.msra.gmra.mxu0 %vm299_vm1, %v3377_v39  ;;  %2851 = vmatmul.msk.f32.vlgmr.msra.gmra.mxu2 %vm299_vm1, %v3436_v59 }
 0x118   : > { %2893 = vmatpush.msk.msra.mxu1 %vm312_vm0, %v1385_v23  ;;  %2898 = vmatpush.msk.msra.mxu2 %vm312_vm0, %v1386_v20  ;;  %v3639_v23 = vld [vmem:[%s4230_s0 + $0x130] sm:$0xff] }
 0x119   : > { %2888 = vmatpush.msk.msra.mxu0 %vm312_vm0, %v1384_v32 }
 0x11a   : > { %v3511_v24 = vpop.f32.mrf.mxu2 }
 0x11b   : > { %v3516_v26 = vpop.f32.mrf.mxu0  ;;  %v3518_v27 = vpop.f32.mrf.mxu1 }
 0x11d   : > { %2880 = vmatmul.msk.f32.vlgmr.msrb.gmra.mxu3 %vm299_vm1, %v2865_v25 }
 0x11e   : > { %2843 = vmatmul.msk.f32.gmra.mxu1 %vm299_vm1, %v3392_v43  ;;  %2931 = vmatpush.msk.msrb.mxu3 %vm312_vm0, %v1667_v58  ;;  %v2358_v58 = vld.sshfl [vmem:[#allocation1] sm:$0xff pattern:$0x75316420] }
 0x11f   : > { %2838 = vmatmul.msk.f32.gmra.mxu0 %vm299_vm1, %v3392_v43  ;;  %2852 = vmatmul.msk.f32.gmra.mxu2 %vm299_vm1, %v3454_v2  ;;  %v2220_v43 = vld.sshfl [vmem:[#allocation1 + $0x18] sm:$0xff pattern:$0x75316420] }
 0x120   : > { %v605_v33 = vpop.f32.mrf.mxu3  ;;  %2357 = vst [vmem:[#allocation1 + $0x10] ss:$2 sm:$0xff] %v3170_v0  ;;  %2227 = vrot.lane.b32.xlu1 %v2220_v43, %s3118_s28  ;;  %v2868_v0 = vld [vmem:[%s4230_s0 + $0xf8] sm:$0xff]  ;;  %v1805_v43 = vpop.permute.xlu2 %1804 }
 0x122   : > { %v3533_v34 = vpop.f32.mrf.mxu2 }
 0x123   : > { %v3538_v35 = vpop.f32.mrf.mxu0  ;;  %v3540_v36 = vpop.f32.mrf.mxu1 }
 0x124   : > { %v454_v20 = vadd.f32 %v3472_v9, %v3538_v35 }
 0x125   : > { %2881 = vmatmul.msk.f32.gmra.mxu3 %vm299_vm1, %v2866_v1 }
 0x126   : > { %2844 = vmatmul.msk.f32.gmra.mxu1 %vm299_vm1, %v3405_v47 }
 0x127   : > { %2839 = vmatmul.msk.f32.gmra.mxu0 %vm299_vm1, %v3405_v47  ;;  %2853 = vmatmul.msk.f32.gmra.mxu2 %vm299_vm1, %v3467_v6  ;;  %v1521_v47 = vpop.permute.xlu1 %1520  ;;  %v2361_v15 = vld.sshfl [vmem:[#allocation1 + $0x18] sm:$0xff pattern:$0x75316420] }
 0x128   : > { %v608_v39 = vpop.f32.mrf.mxu3  ;;  %v1526_v52 = vsel %vm1524_vm9, %v3475_v10, %v1521_v47  ;;  %v1527_v8 = vsel %vm1524_vm9, %v1521_v47, %v1523_v5  ;;  %2368 = vrot.lane.b32.xlu0 %v2361_v15, %s3119_s5  ;;  %v1944_v15 = vpop.permute.xlu2 %1943 }
 0x12a   : > { %v3552_v40 = vpop.f32.mrf.mxu2 }
 0x12b   : > { %v3557_v42 = vpop.f32.mrf.mxu1 }
 0x12c   : > { %v3559_v44 = vpop.f32.mrf.mxu0 }
 0x12d   : > { %2882 = vmatmul.msk.f32.gmra.mxu3 %vm299_vm1, %v2867_v41  ;;  %v457_v31 = vadd.f32 %v3502_v22, %v3559_v44 }
 0x12e   : > { %2845 = vmatmul.msk.f32.gmra.mxu1 %vm299_vm1, %v3416_v50 }
 0x12f   : > { %2840 = vmatmul.msk.f32.gmra.mxu0 %vm299_vm1, %v3416_v50  ;;  %2854 = vmatmul.msk.f32.gmra.mxu2 %vm299_vm1, %v3488_v13  ;;  %v1803_v9 = vpop.permute.xlu1 %1802 }
 0x130   : > { %v611_v45 = vpop.f32.mrf.mxu3  ;;  %v1809_v47 = vsel %vm1806_vm12, %v1803_v9, %v1805_v43 }
 0x132   : > { %v3570_v46 = vpop.f32.mrf.mxu2 }
 0x133   : > { %v3575_v48 = vpop.f32.mrf.mxu1 }
 0x134   : > { %v476_v49 = vpop.f32.mrf.mxu0  ;;  %v506_v35 = vadd.f32 %v3575_v48, %v3511_v24  ;;  %v2360_v24 = vld.sshfl [vmem:[#allocation1 + $0x10] sm:$0xff pattern:$0x75316420] }
 0x135   : > { %v477_v51 = vadd.f32 %v476_v49, %v3492_v18  ;;  %2883 = vmatmul.msk.f32.gmra.mxu3 %vm299_vm1, %v2868_v0  ;;  %v1801_v18 = vpop.permute.xlu0 %1800  ;;  %2366 = vrot.lane.b32.xlu2 %v2360_v24, %s3119_s5  ;;  %v3690_v49 = vld [vmem:[%s4230_s0 + $0x140] sm:$0xff] }
 0x136   : > { %2870 = vmatmul.msk.f32.vlgmr.msrb.gmra.mxu1 %vm299_vm1, %v2865_v25 }
 0x137   : > { %v3582_v50 = vadd.f32 %v605_v33, %v477_v51  ;;  %2861 = vmatmul.msk.f32.vlgmr.msrb.gmra.mxu0 %vm299_vm1, %v3436_v59  ;;  %2875 = vmatmul.msk.f32.vlgmr.msrb.gmra.mxu2 %vm299_vm1, %v2865_v25  ;;  %v3600_v59 = vld [vmem:[%s4230_s0 + $0x120] sm:$0xff]  ;;  %v1799_v44 = vpop.permute.xlu1 %1798 }
 0x138   : > { %2912 = vmatpush.msk.msrb.mxu0 %vm312_vm0, %v1526_v52  ;;  %v614_v56 = vpop.f32.mrf.mxu3  ;;  %2926 = vmatpush.msk.msrb.mxu2 %vm312_vm0, %v1666_v57 }
 0x139   : > { %2917 = vmatpush.msk.msrb.mxu1 %vm312_vm0, %v1527_v8  ;;  %v2886_v8 = vld [vmem:[%s4230_s0 + $0x110] sm:$0xff] }
 0x13a   : > { %v3595_v60 = vpop.f32.mrf.mxu2 }
 0x13b   : > { %v3602_v61 = vpop.f32.mrf.mxu1 }
 0x13c   : > { %v479_v62 = vpop.f32.mrf.mxu0  ;;  %v509_v51 = vadd.f32 %v3602_v61, %v3533_v34 }
 0x13d   : > { %v480_v3 = vadd.f32 %v479_v62, %v3518_v27  ;;  %2908 = vmatmul.msk.f32.vlgmr.msra.gmra.mxu3 %vm299_vm1, %v3600_v59  ;;  %v1664_v33 = vpop.permute.xlu0 %1663  ;;  %2362 = vrot.lane.b32.xlu2 %v2358_v58, %s3119_s5  ;;  %v3713_v62 = vld [vmem:[%s4230_s0 + $0x148] sm:$0xff] }
 0x13e   : > { %2871 = vmatmul.msk.f32.gmra.mxu1 %vm299_vm1, %v2866_v1  ;;  %2955 = vmatpush.msk.msra.mxu3 %vm312_vm0, %v1809_v47 }
 0x13f   : > { %v3608_v4 = vadd.f32 %v608_v39, %v480_v3  ;;  %2862 = vmatmul.msk.f32.gmra.mxu0 %vm299_vm1, %v3454_v2  ;;  %2876 = vmatmul.msk.f32.gmra.mxu2 %vm299_vm1, %v2866_v1  ;;  %v3659_v1 = vld [vmem:[%s4230_s0 + $0x138] sm:$0xff]  ;;  %v1668_v39 = vsel %vm1665_vm11, %v3587_v53, %v1664_v33 }
 0x140   : > { %v775_v7 = vpop.f32.mrf.mxu3 }
 0x142   : > { %v3615_v10 = vpop.f32.mrf.mxu2 }
 0x143   : > { %v3622_v12 = vpop.f32.mrf.mxu1 }
 0x144   : > { %v482_v14 = vpop.f32.mrf.mxu0  ;;  %v512_v3 = vadd.f32 %v3622_v12, %v3552_v40  ;;  %v3735_v12 = vld [vmem:[%s4230_s0 + $0x150] sm:$0xff] }
 0x145   : > { %v483_v2 = vadd.f32 %v482_v14, %v3540_v36  ;;  %2909 = vmatmul.msk.f32.gmra.mxu3 %vm299_vm1, %v3620_v11 }
 0x146   : > { %2872 = vmatmul.msk.f32.gmra.mxu1 %vm299_vm1, %v2867_v41 }
 0x147   : > { %v3629_v16 = vadd.f32 %v611_v45, %v483_v2  ;;  %2863 = vmatmul.msk.f32.gmra.mxu0 %vm299_vm1, %v3467_v6  ;;  %2877 = vmatmul.msk.f32.gmra.mxu2 %vm299_vm1, %v2867_v41  ;;  %v1808_v41 = vsel %vm1806_vm12, %v1801_v18, %v1803_v9 }
 0x148   : > { %v778_v19 = vpop.f32.mrf.mxu3 }
 0x14a   : > { %v582_v21 = vpop.f32.mrf.mxu2 }
 0x14b   : > { %v3641_v25 = vadd.f32 %v582_v21, %v454_v20  ;;  %v3643_v27 = vpop.f32.mrf.mxu1 }
 0x14c   : > { %v485_v28 = vpop.f32.mrf.mxu0 }
 0x14d   : > { %v486_v6 = vadd.f32 %v485_v28, %v3557_v42  ;;  %2910 = vmatmul.msk.f32.gmra.mxu3 %vm299_vm1, %v3639_v23  ;;  %v2887_v28 = vld [vmem:[%s4230_s0 + $0x118] sm:$0xff] }
 0x14e   : > { %2873 = vmatmul.msk.f32.gmra.mxu1 %vm299_vm1, %v2868_v0 }
 0x14f   : > { %v3649_v29 = vadd.f32 %v614_v56, %v486_v6  ;;  %2864 = vmatmul.msk.f32.gmra.mxu0 %vm299_vm1, %v3488_v13  ;;  %2878 = vmatmul.msk.f32.gmra.mxu2 %vm299_vm1, %v2868_v0  ;;  %v1807_v0 = vsel %vm1806_vm12, %v1799_v44, %v1801_v18 }
 0x150   : > { %v781_v30 = vpop.f32.mrf.mxu3 }
 0x152   : > { %v585_v32 = vpop.f32.mrf.mxu2 }
 0x153   : > { %v3663_v36 = vadd.f32 %v585_v32, %v457_v31  ;;  %v3665_v13 = vpop.f32.mrf.mxu1  ;;  %v3750_v31 = vpop.permute.xlu2 %2082 }
 0x154   : > { %v634_v38 = vpop.f32.mrf.mxu0 }
 0x155   : > { %v648_v22 = vadd.f32 %v634_v38, %v506_v35  ;;  %2911 = vmatmul.msk.f32.gmra.mxu3 %vm299_vm1, %v3659_v1 }
 0x156   : > { %2894 = vmatmul.msk.f32.vlgmr.msra.gmra.mxu1 %vm299_vm1, %v2884_v37 }
 0x157   : > { %v3677_v42 = vadd.f32 %v775_v7, %v648_v22  ;;  %2889 = vmatmul.msk.f32.vlgmr.msra.gmra.mxu0 %vm299_vm1, %v2884_v37  ;;  %2899 = vmatmul.msk.f32.vlgmr.msra.gmra.mxu2 %vm299_vm1, %v2884_v37  ;;  %v3765_v37 = vld [vmem:[%s4230_s0 + $0x158] sm:$0xff] }
 0x158   : > { %2936 = vmatpush.msk.msra.mxu0 %vm312_vm0, %v1668_v39  ;;  %v784_v45 = vpop.f32.mrf.mxu3  ;;  %2950 = vmatpush.msk.msra.mxu2 %vm312_vm0, %v1808_v41  ;;  %v1946_v41 = vpop.permute.xlu0 %1945 }
 0x159   : > { %2945 = vmatpush.msk.msra.mxu1 %vm312_vm0, %v1807_v0  ;;  %v1950_v43 = vsel %vm1947_vm14, %v1944_v15, %v1946_v41 }
 0x15a   : > { %v746_v48 = vpop.f32.mrf.mxu2 }
 0x15b   : > { %v3695_v52 = vadd.f32 %v746_v48, %v3582_v50  ;;  %v3697_v53 = vpop.f32.mrf.mxu1 }
 0x15c   : > { %v637_v56 = vpop.f32.mrf.mxu0 }
 0x15d   : > { %v651_v57 = vadd.f32 %v637_v56, %v509_v51  ;;  %2932 = vmatmul.msk.f32.vlgmr.msrb.gmra.mxu3 %vm299_vm1, %v3690_v49 }
 0x15e   : > { %2895 = vmatmul.msk.f32.gmra.mxu1 %vm299_vm1, %v2885_v55 }
 0x15f   : > { %v3706_v34 = vadd.f32 %v778_v19, %v651_v57  ;;  %2890 = vmatmul.msk.f32.gmra.mxu0 %vm299_vm1, %v2885_v55  ;;  %2900 = vmatmul.msk.f32.gmra.mxu2 %vm299_vm1, %v2885_v55  ;;  %v515_v19 = vadd.f32 %v3643_v27, %v3570_v46  ;;  %v448_v46 = vadd.f32 %v3425_v54, %v3490_v17  ;;  %v2942_v57 = vld [vmem:[%s4230_s0 + $0x168] sm:$0xff] }
 0x160   : > { %v999_v50 = vpop.f32.mrf.mxu3 }
 0x161   : > { %v646_v33 = vadd.f32 %v3595_v60, %v448_v46 }
 0x162   : > { %v749_v61 = vpop.f32.mrf.mxu2 }
 0x163   : > { %v3718_v5 = vadd.f32 %v749_v61, %v3608_v4  ;;  %v3720_v7 = vpop.f32.mrf.mxu1  ;;  %v787_v54 = vadd.f32 %v3665_v13, %v646_v33  ;;  %v451_v13 = vadd.f32 %v3449_v63, %v3516_v26  ;;  %v2941_v63 = vld [vmem:[%s4230_s0 + $0x160] sm:$0xff] }
 0x164   : > { %v640_v14 = vpop.f32.mrf.mxu0  ;;  %v793_v58 = vadd.f32 %v3720_v7, %v3641_v25  ;;  %v2222_v25 = vpop.permute.xlu2 %2221 }
 0x165   : > { %v654_v2 = vadd.f32 %v640_v14, %v512_v3  ;;  %2933 = vmatmul.msk.f32.gmra.mxu3 %vm299_vm1, %v3713_v62  ;;  %v2943_v14 = vld [vmem:[%s4230_s0 + $0x170] sm:$0xff] }
 0x166   : > { %2896 = vmatmul.msk.f32.gmra.mxu1 %vm299_vm1, %v2886_v8 }
 0x167   : > { %v3728_v18 = vadd.f32 %v781_v30, %v654_v2  ;;  %2891 = vmatmul.msk.f32.gmra.mxu0 %vm299_vm1, %v2886_v8  ;;  %2901 = vmatmul.msk.f32.gmra.mxu2 %vm299_vm1, %v2886_v8  ;;  %v2081_v30 = vpop.permute.xlu1 %2080 }
 0x168   : > { %v1002_v40 = vpop.f32.mrf.mxu3  ;;  %v2089_v27 = vsel %vm2088_vm13, %v2081_v30, %v3750_v31 }
 0x169   : > { %2983 = vmatpush.msk.msrb.mxu3 %vm312_vm0, %v2089_v27 }
 0x16a   : > { %v752_v4 = vpop.f32.mrf.mxu2 }
 0x16b   : > { %v3740_v20 = vadd.f32 %v752_v4, %v3629_v16  ;;  %v3742_v21 = vpop.f32.mrf.mxu1 }
 0x16c   : > { %v643_v6 = vpop.f32.mrf.mxu0  ;;  %v796_v2 = vadd.f32 %v3742_v21, %v3663_v36  ;;  %v2085_v21 = vpop.permute.xlu2 %2084 }
 0x16d   : > { %v657_v9 = vadd.f32 %v643_v6, %v515_v19  ;;  %2934 = vmatmul.msk.f32.gmra.mxu3 %vm299_vm1, %v3735_v12  ;;  %v2090_v27 = vsel %vm2088_vm13, %v3750_v31, %v2085_v21 }
 0x16e   : > { %2897 = vmatmul.msk.f32.gmra.mxu1 %vm299_vm1, %v2887_v28 }
 0x16f   : > { %v3754_v16 = vadd.f32 %v784_v45, %v657_v9  ;;  %2892 = vmatmul.msk.f32.gmra.mxu0 %vm299_vm1, %v2887_v28  ;;  %2902 = vmatmul.msk.f32.gmra.mxu2 %vm299_vm1, %v2887_v28  ;;  %v1942_v60 = vpop.permute.xlu1 %1941  ;;  %v649_v45 = vadd.f32 %v3615_v10, %v451_v13  ;;  %v1940_v10 = vpop.permute.xlu0 %1939  ;;  %v2944_v28 = vld [vmem:[%s4230_s0 + $0x178] sm:$0xff] }
 0x170   : > { %v1005_v32 = vpop.f32.mrf.mxu3  ;;  %v1949_v24 = vsel %vm1947_vm14, %v1942_v60, %v1944_v15 }
 0x171   : > { %v790_v26 = vadd.f32 %v3697_v53, %v649_v45 }
 0x172   : > { %v755_v35 = vpop.f32.mrf.mxu2 }
 0x173   : > { %v3769_v17 = vadd.f32 %v755_v35, %v3649_v29  ;;  %v3771_v38 = vpop.f32.mrf.mxu1 }
 0x174   : > { %v858_v22 = vpop.f32.mrf.mxu0  ;;  %v929_v6 = vadd.f32 %v3771_v38, %v3695_v52 }
 0x175   : > { %v928_v39 = vadd.f32 %v858_v22, %v787_v54  ;;  %2935 = vmatmul.msk.f32.gmra.mxu3 %vm299_vm1, %v3765_v37 }
 0x176   : > { %2918 = vmatmul.msk.f32.vlgmr.msrb.gmra.mxu1 %vm299_vm1, %v3600_v59 }
 0x177   : > { %v3780_v29 = vadd.f32 %v999_v50, %v928_v39  ;;  %2913 = vmatmul.msk.f32.vlgmr.msrb.gmra.mxu0 %vm299_vm1, %v3600_v59  ;;  %2927 = vmatmul.msk.f32.vlgmr.msrb.gmra.mxu2 %vm299_vm1, %v3690_v49  ;;  %v3867_v52 = vpop.permute.xlu1 %2225 }
 0x178   : > { %v1008_v44 = vpop.f32.mrf.mxu3  ;;  %2969 = vmatpush.msk.msrb.mxu1 %vm312_vm0, %v1949_v24  ;;  %2974 = vmatpush.msk.msrb.mxu2 %vm312_vm0, %v1950_v43 }
 0x17a   : > { %v916_v47 = vpop.f32.mrf.mxu2 }
 0x17b   : > { %v3795_v59 = vadd.f32 %v916_v47, %v3677_v42  ;;  %v3797_v0 = vpop.f32.mrf.mxu1  ;;  %v1948_v42 = vsel %vm1947_vm14, %v1940_v10, %v1942_v60  ;;  %v3920_v10 = vld [vmem:[%s4230_s0 + $0x1b0] sm:$0xff] }
 0x17c   : > { %v861_v48 = vpop.f32.mrf.mxu0  ;;  %2964 = vmatpush.msk.msrb.mxu0 %vm312_vm0, %v1948_v42  ;;  %v932_v38 = vadd.f32 %v3797_v0, %v3718_v5 }
 0x17d   : > { %v931_v51 = vadd.f32 %v861_v48, %v790_v26  ;;  %2956 = vmatmul.msk.f32.vlgmr.msra.gmra.mxu3 %vm299_vm1, %v2941_v63 }
 0x17e   : > { %2919 = vmatmul.msk.f32.gmra.mxu1 %vm299_vm1, %v3620_v11 }
 0x17f   : > { %v3802_v55 = vadd.f32 %v1002_v40, %v931_v51  ;;  %2914 = vmatmul.msk.f32.gmra.mxu0 %vm299_vm1, %v3620_v11  ;;  %2928 = vmatmul.msk.f32.gmra.mxu2 %vm299_vm1, %v3713_v62 }
 0x180   : > { %v1169_v53 = vpop.f32.mrf.mxu3 }
 0x182   : > { %v919_v56 = vpop.f32.mrf.mxu2 }
 0x183   : > { %v3816_v50 = vadd.f32 %v919_v56, %v3706_v34  ;;  %v3818_v11 = vpop.f32.mrf.mxu1 }
 0x184   : > { %v864_v61 = vpop.f32.mrf.mxu0  ;;  %v935_v45 = vadd.f32 %v3818_v11, %v3740_v20  ;;  %v2365_v20 = vpop.permute.xlu1 %2364 }
 0x185   : > { %v934_v3 = vadd.f32 %v864_v61, %v793_v58  ;;  %2957 = vmatmul.msk.f32.gmra.mxu3 %vm299_vm1, %v2942_v57 }
 0x186   : > { %2920 = vmatmul.msk.f32.gmra.mxu1 %vm299_vm1, %v3639_v23 }
 0x187   : > { %v3823_v8 = vadd.f32 %v1005_v32, %v934_v3  ;;  %2915 = vmatmul.msk.f32.gmra.mxu0 %vm299_vm1, %v3639_v23  ;;  %2929 = vmatmul.msk.f32.gmra.mxu2 %vm299_vm1, %v3735_v12  ;;  %v3940_v3 = vld [vmem:[%s4230_s0 + $0x1b8] sm:$0xff] }
 0x188   : > { %v1172_v34 = vpop.f32.mrf.mxu3 }
 0x18a   : > { %v922_v7 = vpop.f32.mrf.mxu2 }
 0x18b   : > { %v3835_v15 = vadd.f32 %v922_v7, %v3728_v18  ;;  %v3837_v40 = vpop.f32.mrf.mxu1 }
 0x18c   : > { %v867_v4 = vpop.f32.mrf.mxu0 }
 0x18d   : > { %v937_v23 = vadd.f32 %v867_v4, %v796_v2  ;;  %2958 = vmatmul.msk.f32.gmra.mxu3 %vm299_vm1, %v2943_v14 }
 0x18e   : > { %2921 = vmatmul.msk.f32.gmra.mxu1 %vm299_vm1, %v3659_v1 }
 0x18f   : > { %v3842_v19 = vadd.f32 %v1008_v44, %v937_v23  ;;  %2916 = vmatmul.msk.f32.gmra.mxu0 %vm299_vm1, %v3659_v1  ;;  %2930 = vmatmul.msk.f32.gmra.mxu2 %vm299_vm1, %v3765_v37  ;;  %v3900_v44 = vld [vmem:[%s4230_s0 + $0x1a8] sm:$0xff]  ;;  %v2367_v58 = vpop.permute.xlu2 %2366 }
 0x190   : > { %v1175_v36 = vpop.f32.mrf.mxu3 }
 0x192   : > { %v925_v18 = vpop.f32.mrf.mxu2  ;;  %v2228_v61 = vpop.permute.xlu1 %2227 }
 0x193   : > { %v3854_v9 = vadd.f32 %v925_v18, %v3754_v16  ;;  %v3856_v30 = vpop.f32.mrf.mxu1  ;;  %v2224_v16 = vpop.permute.xlu0 %2223  ;;  %v2232_v2 = vsel %vm2229_vm15, %v3867_v52, %v2228_v61 }
 0x194   : > { %v1028_v46 = vpop.f32.mrf.mxu0  ;;  %v2230_v31 = vsel %vm2229_vm15, %v2222_v25, %v2224_v16  ;;  %v2231_v35 = vsel %vm2229_vm15, %v2224_v16, %v3867_v52 }
 0x195   : > { %v1070_v1 = vadd.f32 %v1028_v46, %v929_v6  ;;  %2959 = vmatmul.msk.f32.gmra.mxu3 %vm299_vm1, %v2944_v28 }
 0x196   : > { %2946 = vmatmul.msk.f32.vlgmr.msra.gmra.mxu1 %vm299_vm1, %v2941_v63  ;;  %3007 = vmatpush.msk.msra.mxu3 %vm312_vm0, %v2231_v35 }
 0x197   : > { %v3862_v32 = vadd.f32 %v1169_v53, %v1070_v1  ;;  %2937 = vmatmul.msk.f32.vlgmr.msra.gmra.mxu0 %vm299_vm1, %v3690_v49  ;;  %2951 = vmatmul.msk.f32.vlgmr.msra.gmra.mxu2 %vm299_vm1, %v2941_v63  ;;  %v3878_v49 = vld [vmem:[%s4230_s0 + $0x1a0] sm:$0xff]  ;;  %v2961_v1 = vld [vmem:[%s4230_s0 + $0x188] sm:$0xff] }
 0x198   : > { %2988 = vmatpush.msk.msra.mxu0 %vm312_vm0, %v2090_v27  ;;  %v1178_v33 = vpop.f32.mrf.mxu3  ;;  %3002 = vmatpush.msk.msra.mxu2 %vm312_vm0, %v2230_v31 }
 0x19a   : > { %v1140_v54 = vpop.f32.mrf.mxu2 }
 0x19b   : > { %v3883_v22 = vadd.f32 %v1140_v54, %v3780_v29  ;;  %v3885_v39 = vpop.f32.mrf.mxu1  ;;  %v2087_v5 = vpop.permute.xlu0 %2086 }
 0x19c   : > { %v1031_v60 = vpop.f32.mrf.mxu0  ;;  %v2091_v29 = vsel %vm2088_vm13, %v2085_v21, %v2087_v5  ;;  %v3968_v21 = vld [vmem:[%s4230_s0 + $0x1c0] sm:$0xff]  ;;  %v1074_v6 = vadd.f32 %v3885_v39, %v3816_v50  ;;  %v4007_v5 = vld [vmem:[%s4230_s0 + $0x1d0] sm:$0xff] }
 0x19d   : > { %v1073_v41 = vadd.f32 %v1031_v60, %v932_v38  ;;  %2984 = vmatmul.msk.f32.vlgmr.msrb.gmra.mxu3 %vm299_vm1, %v3878_v49  ;;  %2993 = vmatpush.msk.msra.mxu1 %vm312_vm0, %v2091_v29  ;;  %v2962_v38 = vld [vmem:[%s4230_s0 + $0x190] sm:$0xff] }
 0x19e   : > { %2947 = vmatmul.msk.f32.gmra.mxu1 %vm299_vm1, %v2942_v57 }
 0x19f   : > { %v3890_v24 = vadd.f32 %v1172_v34, %v1073_v41  ;;  %2938 = vmatmul.msk.f32.gmra.mxu0 %vm299_vm1, %v3713_v62  ;;  %2952 = vmatmul.msk.f32.gmra.mxu2 %vm299_vm1, %v2942_v57 }
 0x1a0   : > { %v1339_v13 = vpop.f32.mrf.mxu3 }
 0x1a2   : > { %v1143_v43 = vpop.f32.mrf.mxu2 }
 0x1a3   : > { %v3905_v47 = vadd.f32 %v1143_v43, %v3802_v55  ;;  %v3907_v62 = vpop.f32.mrf.mxu1  ;;  %v938_v55 = vadd.f32 %v3837_v40, %v3769_v17  ;;  %v2369_v23 = vpop.permute.xlu0 %2368 }
 0x1a4   : > { %v1034_v63 = vpop.f32.mrf.mxu0  ;;  %v1077_v31 = vadd.f32 %v3907_v62, %v3835_v15 }
 0x1a5   : > { %v1076_v26 = vadd.f32 %v1034_v63, %v935_v45  ;;  %2985 = vmatmul.msk.f32.gmra.mxu3 %vm299_vm1, %v3900_v44  ;;  %v2963_v45 = vld [vmem:[%s4230_s0 + $0x198] sm:$0xff] }
 0x1a6   : > { %2948 = vmatmul.msk.f32.gmra.mxu1 %vm299_vm1, %v2943_v14 }
 0x1a7   : > { %v3912_v0 = vadd.f32 %v1175_v36, %v1076_v26  ;;  %2939 = vmatmul.msk.f32.gmra.mxu0 %vm299_vm1, %v3735_v12  ;;  %2953 = vmatmul.msk.f32.gmra.mxu2 %vm299_vm1, %v2943_v14  ;;  %v2363_v36 = vpop.permute.xlu2 %2362 }
 0x1a8   : > { %v1342_v48 = vpop.f32.mrf.mxu3 }
 0x1aa   : > { %v1146_v51 = vpop.f32.mrf.mxu2 }
 0x1ab   : > { %v3925_v42 = vadd.f32 %v1146_v51, %v3823_v8  ;;  %v3927_v53 = vpop.f32.mrf.mxu1  ;;  %v1071_v8 = vadd.f32 %v3856_v30, %v3795_v59  ;;  %v2372_v59 = vsel %vm2370_vm2, %v2365_v20, %v2367_v58 }
 0x1ac   : > { %v1037_v56 = vpop.f32.mrf.mxu0 }
 0x1ad   : > { %v1079_v12 = vadd.f32 %v1037_v56, %v938_v55  ;;  %2986 = vmatmul.msk.f32.gmra.mxu3 %vm299_vm1, %v3920_v10 }
 0x1ae   : > { %2949 = vmatmul.msk.f32.gmra.mxu1 %vm299_vm1, %v2944_v28 }
 0x1af   : > { %v3932_v57 = vadd.f32 %v1178_v33, %v1079_v12  ;;  %2940 = vmatmul.msk.f32.gmra.mxu0 %vm299_vm1, %v3765_v37  ;;  %2954 = vmatmul.msk.f32.gmra.mxu2 %vm299_vm1, %v2944_v28  ;;  %v2960_v37 = vld [vmem:[%s4230_s0 + $0x180] sm:$0xff]  ;;  %v2371_v28 = vsel %vm2370_vm2, %v2363_v36, %v2365_v20  ;;  %v3989_v33 = vld [vmem:[%s4230_s0 + $0x1c8] sm:$0xff] }
 0x1b0   : > { %v1345_v17 = vpop.f32.mrf.mxu3 }
 0x1b2   : > { %v1149_v11 = vpop.f32.mrf.mxu2 }
 0x1b3   : > { %v3945_v25 = vadd.f32 %v1149_v11, %v3842_v19  ;;  %v3947_v34 = vpop.f32.mrf.mxu1  ;;  %v2373_v19 = vsel %vm2370_vm2, %v2367_v58, %v2369_v23 }
 0x1b4   : > { %v1198_v7 = vpop.f32.mrf.mxu0  ;;  %3031 = vmatpush.msk.msrb.mxu3 %vm312_vm0, %v2373_v19 }
 0x1b5   : > { %v1212_v14 = vadd.f32 %v1198_v7, %v1071_v8  ;;  %2987 = vmatmul.msk.f32.gmra.mxu3 %vm299_vm1, %v3940_v3 }
 0x1b6   : > { %2970 = vmatmul.msk.f32.vlgmr.msrb.gmra.mxu1 %vm299_vm1, %v2960_v37 }
 0x1b7   : > { %v3958_v40 = vadd.f32 %v1339_v13, %v1212_v14  ;;  %2965 = vmatmul.msk.f32.vlgmr.msrb.gmra.mxu0 %vm299_vm1, %v2960_v37  ;;  %2975 = vmatmul.msk.f32.vlgmr.msrb.gmra.mxu2 %vm299_vm1, %v2960_v37  ;;  %v1080_v13 = vadd.f32 %v3927_v53, %v3854_v9 }
 0x1b8   : > { %3012 = vmatpush.msk.msrb.mxu0 %vm312_vm0, %v2232_v2  ;;  %v1348_v4 = vpop.f32.mrf.mxu3  ;;  %3026 = vmatpush.msk.msrb.mxu2 %vm312_vm0, %v2372_v59  ;;  %v3018_v2 = vld [vmem:[%s4230_s0 + $0x1e8] sm:$0xff] }
 0x1b9   : > { %3021 = vmatpush.msk.msrb.mxu1 %vm312_vm0, %v2371_v28  ;;  %v3019_v28 = vld [vmem:[%s4230_s0 + $0x1f0] sm:$0xff]  ;;  %vm257_vm0 = vcmask 15360  }
 0x1ba   : > { %v1310_v18 = vpop.f32.mrf.mxu2 }
 0x1bb   : > { %v1352_v30 = vadd.f32 %v1310_v18, %v3862_v32  ;;  %v1284_v46 = vpop.f32.mrf.mxu1 }
 0x1bc   : > { %v1201_v27 = vpop.f32.mrf.mxu0  ;;  %v1354_v11 = vadd.f32 %v1284_v46, %v3905_v47 }
 0x1bd   : > { %v1215_v52 = vadd.f32 %v1201_v27, %v1074_v6  ;;  %3008 = vmatmul.msk.f32.vlgmr.msra.gmra.mxu3 %vm299_vm1, %v3968_v21 }
 0x1be   : > { %2971 = vmatmul.msk.f32.gmra.mxu1 %vm299_vm1, %v2961_v1 }
 0x1bf   : > { %v3982_v16 = vadd.f32 %v1342_v48, %v1215_v52  ;;  %2966 = vmatmul.msk.f32.gmra.mxu0 %vm299_vm1, %v2961_v1  ;;  %2976 = vmatmul.msk.f32.gmra.mxu2 %vm299_vm1, %v2961_v1  ;;  %v1351_v48 = vadd.f32 %v3947_v34, %v3883_v22 }
 0x1c0   : > { %v1563_v50 = vpop.f32.mrf.mxu3 }
 0x1c2   : > { %v1313_v32 = vpop.f32.mrf.mxu2 }
 0x1c3   : > { %v1355_v35 = vadd.f32 %v1313_v32, %v3890_v24  ;;  %v1287_v54 = vpop.f32.mrf.mxu1 }
 0x1c4   : > { %v1204_v39 = vpop.f32.mrf.mxu0  ;;  %v1357_v59 = vadd.f32 %v1287_v54, %v3925_v42 }
 0x1c5   : > { %v1218_v60 = vadd.f32 %v1204_v39, %v1077_v31  ;;  %3009 = vmatmul.msk.f32.gmra.mxu3 %vm299_vm1, %v3989_v33 }
 0x1c6   : > { %2972 = vmatmul.msk.f32.gmra.mxu1 %vm299_vm1, %v2962_v38 }
 0x1c7   : > { %v4000_v41 = vadd.f32 %v1345_v17, %v1218_v60  ;;  %2967 = vmatmul.msk.f32.gmra.mxu0 %vm299_vm1, %v2962_v38  ;;  %2977 = vmatmul.msk.f32.gmra.mxu2 %vm299_vm1, %v2962_v38 }
 0x1c8   : > { %v1566_v15 = vpop.f32.mrf.mxu3 }
 0x1ca   : > { %v1316_v24 = vpop.f32.mrf.mxu2 }
 0x1cb   : > { %v1358_v29 = vadd.f32 %v1316_v24, %v3912_v0  ;;  %v1290_v43 = vpop.f32.mrf.mxu1  ;;  %v4023_v0 = vld [vmem:[%s4230_s0 + $0x1d8] sm:$0xff] }
 0x1cc   : > { %v1207_v62 = vpop.f32.mrf.mxu0  ;;  %v1360_v6 = vadd.f32 %v1290_v43, %v3945_v25 }
 0x1cd   : > { %v1221_v63 = vadd.f32 %v1207_v62, %v1080_v13  ;;  %3010 = vmatmul.msk.f32.gmra.mxu3 %vm299_vm1, %v4007_v5 }
 0x1ce   : > { %2973 = vmatmul.msk.f32.gmra.mxu1 %vm299_vm1, %v2963_v45 }
 0x1cf   : > { %v1362_v26 = vadd.f32 %v1348_v4, %v1221_v63  ;;  %2968 = vmatmul.msk.f32.gmra.mxu0 %vm299_vm1, %v2963_v45  ;;  %2978 = vmatmul.msk.f32.gmra.mxu2 %vm299_vm1, %v2963_v45 }
 0x1d0   : > { %v1569_v9 = vpop.f32.mrf.mxu3 }
 0x1d2   : > { %v1319_v20 = vpop.f32.mrf.mxu2 }
 0x1d3   : > { %v1361_v51 = vadd.f32 %v1319_v20, %v3932_v57  ;;  %v1451_v55 = vpop.f32.mrf.mxu1  ;;  %v3017_v57 = vld [vmem:[%s4230_s0 + $0x1e0] sm:$0xff] }
 0x1d4   : > { %v1422_v53 = vpop.f32.mrf.mxu0  ;;  %v1493_v56 = vadd.f32 %v1451_v55, %v1352_v30 }
 0x1d5   : > { %v1492_v12 = vadd.f32 %v1422_v53, %v1351_v48  ;;  %3011 = vmatmul.msk.f32.gmra.mxu3 %vm299_vm1, %v4023_v0 }
 0x1d6   : > { %2994 = vmatmul.msk.f32.vlgmr.msra.gmra.mxu1 %vm299_vm1, %v3878_v49 }
 0x1d7   : > { %v1633_v17 = vadd.f32 %v1563_v50, %v1492_v12  ;;  %2989 = vmatmul.msk.f32.vlgmr.msra.gmra.mxu0 %vm299_vm1, %v3878_v49  ;;  %3003 = vmatmul.msk.f32.vlgmr.msra.gmra.mxu2 %vm299_vm1, %v3968_v21  ;;  %v3020_v50 = vld [vmem:[%s4230_s0 + $0x1f8] sm:$0xff] }
 0x1d8   : > { %v1572_v22 = vpop.f32.mrf.mxu3 }
 0x1da   : > { %v1480_v58 = vpop.f32.mrf.mxu2 }
 0x1db   : > { %v1494_v61 = vadd.f32 %v1480_v58, %v3958_v40  ;;  %v1454_v8 = vpop.f32.mrf.mxu1 }
 0x1dc   : > { %v1425_v34 = vpop.f32.mrf.mxu0  ;;  %v1496_v37 = vadd.f32 %v1454_v8, %v1355_v35 }
 0x1dd   : > { %v1495_v7 = vadd.f32 %v1425_v34, %v1354_v11  ;;  %3032 = vmatmul.msk.f32.vlgmr.msrb.gmra.mxu3 %vm299_vm1, %v3017_v57 }
 0x1de   : > { %2995 = vmatmul.msk.f32.gmra.mxu1 %vm299_vm1, %v3900_v44 }
 0x1df   : > { %v1636_v49 = vadd.f32 %v1566_v15, %v1495_v7  ;;  %2990 = vmatmul.msk.f32.gmra.mxu0 %vm299_vm1, %v3900_v44  ;;  %3004 = vmatmul.msk.f32.gmra.mxu2 %vm299_vm1, %v3989_v33 }
 0x1e0   : > { %v1733_v14 = vpop.f32.mrf.mxu3 }
 0x1e2   : > { %v1483_v47 = vpop.f32.mrf.mxu2 }
 0x1e3   : > { %v1497_v40 = vadd.f32 %v1483_v47, %v3982_v16  ;;  %v1457_v4 = vpop.f32.mrf.mxu1 }
 0x1e4   : > { %v1428_v23 = vpop.f32.mrf.mxu0  ;;  %v1499_v19 = vadd.f32 %v1457_v4, %v1358_v29 }
 0x1e5   : > { %v1498_v36 = vadd.f32 %v1428_v23, %v1357_v59  ;;  %3033 = vmatmul.msk.f32.gmra.mxu3 %vm299_vm1, %v3018_v2 }
 0x1e6   : > { %2996 = vmatmul.msk.f32.gmra.mxu1 %vm299_vm1, %v3920_v10 }
 0x1e7   : > { %v1639_v44 = vadd.f32 %v1569_v9, %v1498_v36  ;;  %2991 = vmatmul.msk.f32.gmra.mxu0 %vm299_vm1, %v3920_v10  ;;  %3005 = vmatmul.msk.f32.gmra.mxu2 %vm299_vm1, %v4007_v5 }
 0x1e8   : > { %v1736_v18 = vpop.f32.mrf.mxu3 }
 0x1ea   : > { %v1486_v42 = vpop.f32.mrf.mxu2 }
 0x1eb   : > { %v1500_v30 = vadd.f32 %v1486_v42, %v4000_v41  ;;  %v1460_v46 = vpop.f32.mrf.mxu1 }
 0x1ec   : > { %v1431_v1 = vpop.f32.mrf.mxu0  ;;  %v1502_v27 = vadd.f32 %v1460_v46, %v1361_v51 }
 0x1ed   : > { %v1501_v52 = vadd.f32 %v1431_v1, %v1360_v6  ;;  %3034 = vmatmul.msk.f32.gmra.mxu3 %vm299_vm1, %v3019_v28 }
 0x1ee   : > { %2997 = vmatmul.msk.f32.gmra.mxu1 %vm299_vm1, %v3940_v3 }
 0x1ef   : > { %v1642_v10 = vadd.f32 %v1572_v22, %v1501_v52  ;;  %2992 = vmatmul.msk.f32.gmra.mxu0 %vm299_vm1, %v3940_v3  ;;  %3006 = vmatmul.msk.f32.gmra.mxu2 %vm299_vm1, %v4023_v0 }
 0x1f0   : > { %v1739_v16 = vpop.f32.mrf.mxu3 }
 0x1f2   : > { %v1489_v25 = vpop.f32.mrf.mxu2 }
 0x1f3   : > { %v1503_v32 = vadd.f32 %v1489_v25, %v1362_v26  ;;  %v1621_v31 = vpop.f32.mrf.mxu1 }
 0x1f4   : > { %v1592_v35 = vpop.f32.mrf.mxu0  ;;  %v1635_v54 = vadd.f32 %v1621_v31, %v1494_v61 }
 0x1f5   : > { %v1634_v38 = vadd.f32 %v1592_v35, %v1493_v56  ;;  %3035 = vmatmul.msk.f32.gmra.mxu3 %vm299_vm1, %v3020_v50 }
 0x1f6   : > { %3022 = vmatmul.msk.f32.vlgmr.msrb.gmra.mxu1 %vm299_vm1, %v3017_v57 }
 0x1f7   : > { %v1775_v39 = vadd.f32 %v1733_v14, %v1634_v38  ;;  %3013 = vmatmul.msk.f32.vlgmr.msrb.gmra.mxu0 %vm299_vm1, %v3968_v21  ;;  %3027 = vmatmul.msk.f32.vlgmr.msrb.gmra.mxu2 %vm299_vm1, %v3017_v57 }
 0x1f8   : > { %v1742_v3 = vpop.f32.mrf.mxu3 }
 0x1fa   : > { %v1704_v60 = vpop.f32.mrf.mxu2 }
 0x1fb   : > { %v1774_v41 = vadd.f32 %v1704_v60, %v1633_v17  ;;  %v1624_v15 = vpop.f32.mrf.mxu1 }
 0x1fc   : > { %v1595_v24 = vpop.f32.mrf.mxu0  ;;  %v1638_v13 = vadd.f32 %v1624_v15, %v1497_v40 }
 0x1fd   : > { %v1637_v29 = vadd.f32 %v1595_v24, %v1496_v37 }
 0x1fe   : > { %3023 = vmatmul.msk.f32.gmra.mxu1 %vm299_vm1, %v3018_v2 }
 0x1ff   : > { %v1778_v43 = vadd.f32 %v1736_v18, %v1637_v29  ;;  %3014 = vmatmul.msk.f32.gmra.mxu0 %vm299_vm1, %v3989_v33  ;;  %3028 = vmatmul.msk.f32.gmra.mxu2 %vm299_vm1, %v3018_v2 }
 0x200   : > { %v1903_v45 = vpop.f32.mrf.mxu3 }
 0x202   : > { %v1707_v62 = vpop.f32.mrf.mxu2 }
 0x203   : > { %v1777_v21 = vadd.f32 %v1707_v62, %v1636_v49  ;;  %v1627_v63 = vpop.f32.mrf.mxu1 }
 0x204   : > { %v1598_v26 = vpop.f32.mrf.mxu0  ;;  %v1641_v9 = vadd.f32 %v1627_v63, %v1500_v30 }
 0x205   : > { %v1640_v20 = vadd.f32 %v1598_v26, %v1499_v19 }
 0x206   : > { %3024 = vmatmul.msk.f32.gmra.mxu1 %vm299_vm1, %v3019_v28 }
 0x207   : > { %v1781_v48 = vadd.f32 %v1739_v16, %v1640_v20  ;;  %3015 = vmatmul.msk.f32.gmra.mxu0 %vm299_vm1, %v4007_v5  ;;  %3029 = vmatmul.msk.f32.gmra.mxu2 %vm299_vm1, %v3019_v28 }
 0x208   : > { %v1906_v51 = vpop.f32.mrf.mxu3 }
 0x20a   : > { %v1710_v55 = vpop.f32.mrf.mxu2 }
 0x20b   : > { %v1780_v33 = vadd.f32 %v1710_v55, %v1639_v44  ;;  %v1630_v53 = vpop.f32.mrf.mxu1 }
 0x20c   : > { %v1601_v56 = vpop.f32.mrf.mxu0  ;;  %v1644_v12 = vadd.f32 %v1630_v53, %v1503_v32 }
 0x20d   : > { %v1643_v17 = vadd.f32 %v1601_v56, %v1502_v27 }
 0x20e   : > { %3025 = vmatmul.msk.f32.gmra.mxu1 %vm299_vm1, %v3020_v50 }
 0x20f   : > { %v1784_v22 = vadd.f32 %v1742_v3, %v1643_v17  ;;  %3016 = vmatmul.msk.f32.gmra.mxu0 %vm299_vm1, %v4023_v0  ;;  %3030 = vmatmul.msk.f32.gmra.mxu2 %vm299_vm1, %v3020_v50  ;;  %vm2583_vm1 = vcmask 7168  }
 0x210   : > { %v1909_v58 = vpop.f32.mrf.mxu3 }
 0x212   : > { %v1713_v57 = vpop.f32.mrf.mxu2 }
 0x213   : > { %v1783_v5 = vadd.f32 %v1713_v57, %v1642_v10  ;;  %v1845_v11 = vpop.f32.mrf.mxu1 }
 0x214   : > { %v1762_v61 = vpop.f32.mrf.mxu0  ;;  %v1915_v8 = vadd.f32 %v1845_v11, %v1774_v41 }
 0x215   : > { %v1776_v34 = vadd.f32 %v1762_v61, %v1635_v54 }
 0x217   : > { %v4092_v37 = vadd.f32 %v1903_v45, %v1776_v34 }
 0x218   : > { %v1912_v7 = vpop.f32.mrf.mxu3 }
 0x21a   : > { %v1874_v49 = vpop.f32.mrf.mxu2 }
 0x21b   : > { %v1916_v14 = vadd.f32 %v1874_v49, %v1775_v39  ;;  %v1848_v47 = vpop.f32.mrf.mxu1 }
 0x21c   : > { %v1765_v2 = vpop.f32.mrf.mxu0  ;;  %v4094_v59 = vadd.f32 %v1848_v47, %v1777_v21 }
 0x21d   : > { %v1779_v40 = vadd.f32 %v1765_v2, %v1638_v13 }
 0x21f   : > { %v4096_v0 = vadd.f32 %v1906_v51, %v1779_v40 }
 0x220   : > { %v2127_v4 = vpop.f32.mrf.mxu3 }
 0x222   : > { %v1877_v23 = vpop.f32.mrf.mxu2 }
 0x223   : > { %v1919_v19 = vadd.f32 %v1877_v23, %v1778_v43  ;;  %v1851_v36 = vpop.f32.mrf.mxu1 }
 0x224   : > { %v1768_v44 = vpop.f32.mrf.mxu0  ;;  %v4098_v18 = vadd.f32 %v1851_v36, %v1780_v33 }
 0x225   : > { %v1782_v42 = vadd.f32 %v1768_v44, %v1641_v9 }
 0x227   : > { %v4100_v28 = vadd.f32 %v1909_v58, %v1782_v42 }
 0x228   : > { %v2130_v6 = vpop.f32.mrf.mxu3 }
 0x22a   : > { %v1880_v30 = vpop.f32.mrf.mxu2 }
 0x22b   : > { %v1922_v46 = vadd.f32 %v1880_v30, %v1781_v48  ;;  %v1854_v1 = vpop.f32.mrf.mxu1 }
 0x22c   : > { %v1771_v27 = vpop.f32.mrf.mxu0  ;;  %v4102_v52 = vadd.f32 %v1854_v1, %v1783_v5 }
 0x22d   : > { %v1785_v10 = vadd.f32 %v1771_v27, %v1644_v12 }
 0x22f   : > { %v4104_v16 = vadd.f32 %v1912_v7, %v1785_v10 }
 0x230   : > { %v4106_v50 = vpop.f32.mrf.mxu3 }
 0x232   : > { %v1883_v25 = vpop.f32.mrf.mxu2 }
 0x233   : > { %v1925_v32 = vadd.f32 %v1883_v25, %v1784_v22  ;;  %v2015_v31 = vpop.f32.mrf.mxu1 }
 0x234   : > { %v1986_v35 = vpop.f32.mrf.mxu0  ;;  %v2057_v54 = vadd.f32 %v2015_v31, %v1916_v14 }
 0x235   : > { %v2056_v5 = vadd.f32 %v1986_v35, %v1915_v8 }
 0x237   : > { %v2197_v34 = vadd.f32 %v2127_v4, %v2056_v5 }
 0x238   : > { %v4108_v41 = vpop.f32.mrf.mxu3 }
 0x23a   : > { %v2044_v38 = vpop.f32.mrf.mxu2 }
 0x23b   : > { %v2018_v39 = vpop.f32.mrf.mxu1  ;;  %v2058_v7 = vadd.f32 %v2044_v38, %v4092_v37  ;;  %v2515_v37 = vld [vmem:[%s4232_s2] sm:$0x7] }
 0x23c   : > { %v1989_v3 = vpop.f32.mrf.mxu0  ;;  %v2060_v60 = vadd.f32 %v2018_v39, %v1919_v19  ;;  %v4145_v27 = vperm.slane %v2515_v37, 0  ;;  %v4150_v38 = vperm.slane %v2515_v37, 2 }
 0x23d   : > { %v2059_v40 = vadd.f32 %v1989_v3, %v4094_v59 }
 0x23f   : > { %v2200_v42 = vadd.f32 %v2130_v6, %v2059_v40 }
 0x240   : > { %v2297_v43 = vpop.f32.mrf.mxu3 }
 0x242   : > { %v2047_v15 = vpop.f32.mrf.mxu2 }
 0x243   : > { %v2021_v24 = vpop.f32.mrf.mxu1  ;;  %v2061_v30 = vadd.f32 %v2047_v15, %v4096_v0 }
 0x244   : > { %v1992_v13 = vpop.f32.mrf.mxu0  ;;  %v4110_v29 = vadd.f32 %v2021_v24, %v1922_v46 }
 0x245   : > { %v2062_v6 = vadd.f32 %v1992_v13, %v4098_v18 }
 0x248   : > { %v2300_v26 = vpop.f32.mrf.mxu3 }
 0x24a   : > { %v4112_v45 = vpop.f32.mrf.mxu2 }
 0x24b   : > { %v2024_v62 = vpop.f32.mrf.mxu1  ;;  %v2064_v18 = vadd.f32 %v4112_v45, %v4100_v28 }
 0x24c   : > { %v4114_v21 = vpop.f32.mrf.mxu0  ;;  %v4116_v63 = vadd.f32 %v2024_v62, %v1925_v32 }
 0x24d   : > { %v2065_v28 = vadd.f32 %v4114_v21, %v4102_v52 }
 0x24f   : > { %v2206_v21 = vadd.f32 %v4108_v41, %v2065_v28 }
 0x250   : > { %v4120_v55 = vpop.f32.mrf.mxu3 }
 0x252   : > { %v4118_v9 = vpop.f32.mrf.mxu2 }
 0x253   : > { %v2185_v20 = vpop.f32.mrf.mxu1 }
 0x254   : > { %v2156_v48 = vpop.f32.mrf.mxu0  ;;  %v2199_v47 = vadd.f32 %v2185_v20, %v2058_v7 }
 0x255   : > { %v2198_v36 = vadd.f32 %v2156_v48, %v2057_v54  ;;  %v4148_v54 = vperm.slane %v2515_v37, 1 }
 0x257   : > { %v2339_v46 = vadd.f32 %v2297_v43, %v2198_v36 }
 0x258   : > { %v4124_v22 = vpop.f32.mrf.mxu3 }
 0x25a   : > { %v2268_v51 = vpop.f32.mrf.mxu2 }
 0x25b   : > { %v2188_v33 = vpop.f32.mrf.mxu1  ;;  %v2338_v49 = vadd.f32 %v2268_v51, %v2197_v34 }
 0x25c   : > { %v2159_v53 = vpop.f32.mrf.mxu0  ;;  %v2202_v32 = vadd.f32 %v2188_v33, %v2061_v30  ;;  %v2203_v33 = vadd.f32 %v4106_v50, %v2062_v6 }
 0x25d   : > { %v2201_v39 = vadd.f32 %v2159_v53, %v2060_v60 }
 0x25f   : > { %v2342_v60 = vadd.f32 %v2300_v26, %v2201_v39 }
 0x260   : > { %v2467_v61 = vpop.f32.mrf.mxu3 }
 0x262   : > { %v2271_v56 = vpop.f32.mrf.mxu2 }
 0x263   : > { %v2191_v12 = vpop.f32.mrf.mxu1  ;;  %v2341_v10 = vadd.f32 %v2271_v56, %v2200_v42 }
 0x264   : > { %v4122_v17 = vpop.f32.mrf.mxu0 }
 0x265   : > { %v2204_v45 = vadd.f32 %v4122_v17, %v4110_v29  ;;  %v2067_v29 = vadd.f32 %v4118_v9, %v4104_v16 }
 0x267   : > { %v2345_v17 = vadd.f32 %v4120_v55, %v2204_v45 }
 0x268   : > { %v2470_v59 = vpop.f32.mrf.mxu3 }
 0x26a   : > { %v2274_v58 = vpop.f32.mrf.mxu2 }
 0x26b   : > { %v4126_v57 = vpop.f32.mrf.mxu1  ;;  %v2344_v34 = vadd.f32 %v2274_v58, %v2203_v33 }
 0x26c   : > { %v4128_v11 = vpop.f32.mrf.mxu0 }
 0x26d   : > { %v2207_v16 = vadd.f32 %v4128_v11, %v4116_v63 }
 0x26f   : > { %v2348_v63 = vadd.f32 %v4124_v22, %v2207_v16 }
 0x272   : > { %v4132_v14 = vpop.f32.mrf.mxu2 }
 0x273   : > { %v2409_v2 = vpop.f32.mrf.mxu1 }
 0x274   : > { %v2326_v23 = vpop.f32.mrf.mxu0  ;;  %v2479_v19 = vadd.f32 %v2409_v2, %v2338_v49  ;;  %v2473_v49 = vpop.f32.mrf.mxu3 }
 0x275   : > { %v2340_v44 = vadd.f32 %v2326_v23, %v2199_v47 }
 0x276   : > { %v2491_v8 = vmax.f32 %v2479_v19, 0.0 }
 0x277   : > { %v2481_v4 = vadd.f32 %v2467_v61, %v2340_v44  ;;  %v2205_v61 = vadd.f32 %v2191_v12, %v2064_v18 }
 0x278   : > { %2503 = vst [vmem:[%s4138_s12] sm:$0xff] %v2491_v8  ;;  %v2523_v43 = vmul.f32 %v4145_v27, %v2491_v8 }
 0x279   : > { %v2493_v1 = vmax.f32 %v2481_v4, 0.0 }
 0x27a   : > { %v2438_v25 = vpop.f32.mrf.mxu2  ;;  %v2551_v56 = vmul.f32 %v2523_v43, %v2491_v8 }
 0x27b   : > { %2505 = vst [vmem:[%s4138_s12 + $0x10] sm:$0xff] %v2493_v1  ;;  %v2480_v31 = vadd.f32 %v2438_v25, %v2339_v46  ;;  %v2412_v35 = vpop.f32.mrf.mxu1  ;;  %v2525_v51 = vmul.f32 %v4150_v38, %v2493_v1 }
 0x27c   : > { %v2329_v0 = vpop.f32.mrf.mxu0  ;;  %v2482_v3 = vadd.f32 %v2412_v35, %v2341_v10  ;;  %v2347_v10 = vadd.f32 %v4132_v14, %v2206_v21  ;;  %v2476_v39 = vpop.f32.mrf.mxu3 }
 0x27d   : > { %v2492_v15 = vmax.f32 %v2480_v31, 0.0  ;;  %v2343_v24 = vadd.f32 %v2329_v0, %v2202_v32  ;;  %v2553_v23 = vmul.f32 %v2525_v51, %v2493_v1  ;;  %v2208_v1 = vadd.f32 %v4126_v57, %v2067_v29 }
 0x27e   : > { %v2494_v62 = vmax.f32 %v2482_v3, 0.0 }
 0x27f   : > { %2504 = vst [vmem:[%s4138_s12 + $0x8] sm:$0xff] %v2492_v15  ;;  %v2484_v20 = vadd.f32 %v2470_v59, %v2343_v24  ;;  %v2524_v48 = vmul.f32 %v4148_v54, %v2492_v15 }
 0x280   : > { %2506 = vst [vmem:[%s4138_s12 + $0x18] sm:$0xff] %v2494_v62  ;;  %v2526_v36 = vmul.f32 %v4145_v27, %v2494_v62 }
 0x281   : > { %v2496_v13 = vmax.f32 %v2484_v20, 0.0  ;;  %v2535_v53 = vadd.f32 %v2524_v48, %v2523_v43  ;;  %v2552_v5 = vmul.f32 %v2524_v48, %v2492_v15 }
 0x282   : > { %v2441_v7 = vpop.f32.mrf.mxu2  ;;  %v2554_v30 = vmul.f32 %v2526_v36, %v2494_v62 }
 0x283   : > { %2508 = vst [vmem:[%s4138_s12 + $0x28] sm:$0xff] %v2496_v13  ;;  %v2483_v47 = vadd.f32 %v2441_v7, %v2342_v60  ;;  %v2415_v2 = vpop.f32.mrf.mxu1  ;;  %v2536_v40 = vadd.f32 %v2535_v53, %v2525_v51  ;;  %v2563_v50 = vadd.f32 %v2552_v5, %v2551_v56  ;;  %v2528_v52 = vmul.f32 %v4150_v38, %v2496_v13 }
 0x284   : > { %v2332_v26 = vpop.f32.mrf.mxu0  ;;  %v2485_v19 = vadd.f32 %v2415_v2, %v2344_v34 }
 0x285   : > { %v2495_v12 = vmax.f32 %v2483_v47, 0.0  ;;  %v2346_v58 = vadd.f32 %v2332_v26, %v2205_v61  ;;  %2537 = vadd.xlane.f32.xlu0 %v2536_v40  ;;  %v2564_v44 = vadd.f32 %v2563_v50, %v2553_v23  ;;  %v2556_v35 = vmul.f32 %v2528_v52, %v2496_v13 }
 0x286   : > { %v2497_v8 = vmax.f32 %v2485_v19, 0.0 }
 0x287   : > { %2507 = vst [vmem:[%s4138_s12 + $0x20] sm:$0xff] %v2495_v12  ;;  %v2487_v37 = vadd.f32 %v2473_v49, %v2346_v58  ;;  %v2527_v4 = vmul.f32 %v4148_v54, %v2495_v12 }
 0x288   : > { %2509 = vst [vmem:[%s4138_s12 + $0x30] sm:$0xff] %v2497_v8  ;;  %v2529_v57 = vmul.f32 %v4145_v27, %v2497_v8 }
 0x289   : > { %v2499_v42 = vmax.f32 %v2487_v37, 0.0  ;;  %v2539_v59 = vadd.f32 %v2527_v4, %v2526_v36  ;;  %v2555_v46 = vmul.f32 %v2527_v4, %v2495_v12 }
 0x28a   : > { %v2444_v25 = vpop.f32.mrf.mxu2  ;;  %v2557_v48 = vmul.f32 %v2529_v57, %v2497_v8 }
 0x28b   : > { %2511 = vst [vmem:[%s4138_s12 + $0x40] sm:$0xff] %v2499_v42  ;;  %v2486_v32 = vadd.f32 %v2444_v25, %v2345_v17  ;;  %v2418_v31 = vpop.f32.mrf.mxu1  ;;  %v2540_v41 = vadd.f32 %v2539_v59, %v2528_v52  ;;  %v2567_v6 = vadd.f32 %v2555_v46, %v2554_v30  ;;  %v2531_v62 = vmul.f32 %v4150_v38, %v2499_v42 }
 0x28c   : > { %v2335_v9 = vpop.f32.mrf.mxu0  ;;  %v2488_v55 = vadd.f32 %v2418_v31, %v2347_v10 }
 0x28d   : > { %v2498_v0 = vmax.f32 %v2486_v32, 0.0  ;;  %v2349_v3 = vadd.f32 %v2335_v9, %v2208_v1  ;;  %2541 = vadd.xlane.f32.xlu1 %v2540_v41  ;;  %2565 = vadd.xlane.f32.xlu0 %v2564_v44  ;;  %v2568_v14 = vadd.f32 %v2567_v6, %v2556_v35  ;;  %v2559_v13 = vmul.f32 %v2531_v62, %v2499_v42 }
 0x28e   : > { %v2500_v15 = vmax.f32 %v2488_v55, 0.0 }
 0x28f   : > { %2510 = vst [vmem:[%s4138_s12 + $0x38] sm:$0xff] %v2498_v0  ;;  %v2490_v24 = vadd.f32 %v2476_v39, %v2349_v3  ;;  %v2530_v43 = vmul.f32 %v4148_v54, %v2498_v0 }
 0x290   : > { %2512 = vst [vmem:[%s4138_s12 + $0x48] sm:$0xff] %v2500_v15  ;;  %v2532_v5 = vmul.f32 %v4145_v27, %v2500_v15  ;;  %v3120_v27 = vmov 0.0  }
 0x291   : > { %v2502_v11 = vmax.f32 %v2490_v24, 0.0  ;;  %v2543_v20 = vadd.f32 %v2530_v43, %v2529_v57  ;;  %v2558_v51 = vmul.f32 %v2530_v43, %v2498_v0  ;;  %258 = vst.msk [vmem:[%s4195_s21] sm:$0xff] %vm257_vm0, %v3120_v27 }
 0x292   : > { %v2447_v33 = vpop.f32.mrf.mxu2  ;;  %v2560_v49 = vmul.f32 %v2532_v5, %v2500_v15  ;;  %259 = vst.msk [vmem:[%s4195_s21 + $0x8] sm:$0xff] %vm257_vm0, %v3120_v27 }
 0x293   : > { %2514 = vst [vmem:[%s4138_s12 + $0x58] sm:$0xff] %v2502_v11  ;;  %v2489_v18 = vadd.f32 %v2447_v33, %v2348_v63  ;;  %v2544_v60 = vadd.f32 %v2543_v20, %v2531_v62  ;;  %v2571_v53 = vadd.f32 %v2558_v51, %v2557_v48  ;;  %v2534_v34 = vmul.f32 %v4150_v38, %v2502_v11 }
 0x294   : > { %260 = vst.msk [vmem:[%s4195_s21 + $0x10] sm:$0xff] %vm257_vm0, %v3120_v27 }
 0x295   : > { %v2501_v56 = vmax.f32 %v2489_v18, 0.0  ;;  %2545 = vadd.xlane.f32.xlu2 %v2544_v60  ;;  %2569 = vadd.xlane.f32.xlu1 %v2568_v14  ;;  %v2572_v61 = vadd.f32 %v2571_v53, %v2559_v13  ;;  %v2562_v40 = vmul.f32 %v2534_v34, %v2502_v11  ;;  %261 = vst.msk [vmem:[%s4195_s21 + $0x18] sm:$0xff] %vm257_vm0, %v3120_v27 }
 0x297   : > { %2513 = vst [vmem:[%s4138_s12 + $0x50] sm:$0xff] %v2501_v56  ;;  %v2533_v22 = vmul.f32 %v4148_v54, %v2501_v56 }
 0x298   : > { %v2579_v38 = vld [vmem:[%s4195_s21] sm:$0xff] }
 0x299   : > { %v2547_v7 = vadd.f32 %v2533_v22, %v2532_v5  ;;  %v2561_v47 = vmul.f32 %v2533_v22, %v2501_v56  ;;  %v2580_v12 = vld [vmem:[%s4195_s21 + $0x8] sm:$0xff] }
 0x29b   : > { %v2548_v2 = vadd.f32 %v2547_v7, %v2534_v34  ;;  %v2575_v23 = vadd.f32 %v2561_v47, %v2560_v49  ;;  %v2581_v17 = vld [vmem:[%s4195_s21 + $0x10] sm:$0xff] }
 0x29c   : > { %v2582_v4 = vld [vmem:[%s4195_s21 + $0x18] sm:$0xff] }
 0x29d   : > { %2549 = vadd.xlane.f32.xlu2 %v2548_v2  ;;  %v2576_v50 = vadd.f32 %v2575_v23, %v2562_v40 }
 0x29f   : > { %2577 = vadd.xlane.f32.xlu0 %v2576_v50 }
 0x2a5   : > { %2573 = vadd.xlane.f32.xlu2 %v2572_v61 }
 0x2f8   : > { %v2538_v54 = vpop.xlane.xlu0 %2537 }
 0x300   : > { %v2542_v28 = vpop.xlane.xlu1 %2541  ;;  %v2566_v45 = vpop.xlane.xlu0 %2565 }
 0x301   : > { %v2584_v26 = vsel %vm2583_vm1, %v2538_v54, %v2566_v45 }
 0x302   : > { %v2588_v19 = vadd.f32 %v2584_v26, %v2579_v38 }
 0x304   : > { %2593 = vst.msk [vmem:[%s4195_s21] sm:$0xff] %vm257_vm0, %v2588_v19 }
 0x308   : > { %v2546_v58 = vpop.xlane.xlu2 %2545  ;;  %v2570_v36 = vpop.xlane.xlu1 %2569 }
 0x309   : > { %v2585_v44 = vsel %vm2583_vm1, %v2542_v28, %v2570_v36 }
 0x30a   : > { %v2589_v8 = vadd.f32 %v2585_v44, %v2580_v12 }
 0x30c   : > { %2594 = vst.msk [vmem:[%s4195_s21 + $0x8] sm:$0xff] %vm257_vm0, %v2589_v8 }
 0x310   : > { %v2550_v37 = vpop.xlane.xlu2 %2549 }
 0x312   : > { %v2578_v52 = vpop.xlane.xlu0 %2577 }
 0x313   : > { %v2587_v21 = vsel %vm2583_vm1, %v2550_v37, %v2578_v52 }
 0x314   : > { %v2591_v29 = vadd.f32 %v2587_v21, %v2582_v4 }
 0x316   : > { %2596 = vst.msk [vmem:[%s4195_s21 + $0x18] sm:$0xff] %vm257_vm0, %v2591_v29 }
 0x318   : > { %v2574_v42 = vpop.xlane.xlu2 %2573 }
 0x319   : > { %v2586_v59 = vsel %vm2583_vm1, %v2546_v58, %v2574_v42 }
 0x31a   : > { %v2590_v30 = vadd.f32 %v2586_v59, %v2581_v17 }
 0x31c   : > { %2595 = vst.msk [vmem:[%s4195_s21 + $0x10] sm:$0xff] %vm257_vm0, %v2590_v30 }
 0x31d PF: > { %s15_s17 = sadd.s32 1, %s3103_s17   ;;  %s4235_s15 = smov %s3099_s16 }
 0x31e   : > { %p12_p5 = scmp.ge.s32.totalorder %s15_s17, 4   ;;  %s4236_s16 = smov %s4238_s18 }
 0x320   :  { %14 = sbr.rel (!%p12_p5) target bundleno = 2 (0x2), region = 113 }

</bundles_post_ra>
